<compile_context>
chip_gen: v7x
topology: tpu7x:2x2x1
jax: 0.10.0
libtpu: 0.0.40
codegen_flags: <defaults>
</compile_context>

<pallas_src>
import functools

import jax
import jax.numpy as jnp
from jax.experimental import pallas as pl
from jax.experimental.pallas import tpu as pltpu

LANE = 128        # lane-padded channel width of the kernel input
MISC_ROWS = 16    # packed bias / alpha array: one vector per sublane row


# ----------------------------------------------------------------------------
# Fused forward kernel (one grid step = `bt` batch elements)
# ----------------------------------------------------------------------------
def _fused_net_kernel(x_ref, w1_ref, w2_ref, wf1_ref, wf2_ref, wf3_ref,
                      misc_ref, o_ref, *, bt, seq_len, ksize):
    f32 = jnp.float32
    pad = ksize // 2
    nf = seq_len // 4                      # time steps left after 2x AvgPool(2)

    def mm(a, w):
        # bf16 operands on the MXU, f32 accumulation.
        return jnp.dot(a.astype(w.dtype), w, preferred_element_type=f32)

    def vec(row, width):
        # One packed bias / PReLU-alpha vector (f32) from the misc pack.
        return misc_ref[row:row + 1, 0:width]

    def prelu(y, alpha_row):
        return jnp.maximum(y, 0.0) + alpha_row * jnp.minimum(y, 0.0)

    def shift_rows(y, d):
        # out[i] = y[i + d], zero-filled at the ends of the row block.
        # (Static sublane shift: same XLU-class work as pltpu.roll, with no
        #  wraparound to mask off afterwards.)
        rows, c = y.shape
        if d == 0:
            return y
        z = jnp.zeros((abs(d), c), y.dtype)
        if d > 0:
            return jnp.concatenate([y[d:, :], z], axis=0)
        return jnp.concatenate([z, y[:rows + d, :]], axis=0)

    def im2col(y, cur_len):
        # y: (bt*cur_len, C) time-major rows -> (bt*cur_len, ksize*C).
        # The iota mask supplies the conv 'same' padding and prevents
        # batch-boundary bleed between the bt row blocks.
        rows = y.shape[0]
        t = jax.lax.broadcasted_iota(jnp.int32, (rows, 1), 0) % cur_len
        pieces = []
        for k in range(ksize):
            d = k - pad
            valid = jnp.logical_and(t + d >= 0, t + d < cur_len)
            pieces.append(jnp.where(valid, shift_rows(y, d), 0.0))
        return jnp.concatenate(pieces, axis=1)

    def avgpool2(y):
        # AvgPool1d(2) over time == average adjacent row pairs (pairs never
        # straddle a batch element because per-element lengths stay even).
        rows, c = y.shape
        y3 = y.reshape(rows // 2, 2, c)
        return 0.5 * (y3[:, 0, :] + y3[:, 1, :])

    # ---- Layer 1: LSC Linear + both conv branches in ONE fused matmul. -----
    x = x_ref[...]                                         # (bt*L, 128) f32
    c1 = w1_ref.shape[1]
    y = mm(im2col(x, seq_len), w1_ref[...]) + vec(0, c1)
    y = avgpool2(prelu(y, vec(5, c1)))                     # (bt*L/2, 32)

    # ---- Layer 2: both conv branches in ONE block-diagonal matmul. ---------
    c2 = w2_ref.shape[1]
    y = mm(im2col(y, seq_len // 2), w2_ref[...]) + vec(1, c2)
    y = avgpool2(prelu(y, vec(6, c2)))                     # (bt*L/4, 64)

    # ---- Flatten (time-major within batch; fc1 rows are pre-permuted). -----
    y3 = y.reshape(bt, nf, c2)
    feat = jnp.concatenate([y3[:, t, :] for t in range(nf)], axis=1)  # (bt, nf*c2)

    # ---- Classifier: fc1 -> PReLU -> fc2 -> PReLU -> fc3 (lane-padded). ----
    h1 = wf1_ref.shape[1]
    h2 = wf2_ref.shape[1]
    z = prelu(mm(feat, wf1_ref[...]) + vec(2, h1), vec(7, h1))
    z = prelu(mm(z, wf2_ref[...]) + vec(3, h2), vec(8, h2))
    z = mm(z, wf3_ref[...]) + vec(4, wf3_ref.shape[1])
    o_ref[...] = z.astype(o_ref.dtype)


# ----------------------------------------------------------------------------
# One-time parameter layout transforms (outside the kernel)
# ----------------------------------------------------------------------------
def _tap_block(w, groups, k):
    """Conv1d weight (C_out, C_in//G, K), tap k -> dense (C_in, C_out) matrix,
    block-diagonal over the groups."""
    c_out, cin_g, _ = w.shape
    cout_g = c_out // groups
    blk = jnp.zeros((cin_g * groups, c_out), jnp.float32)
    for g in range(groups):
        blk = blk.at[g * cin_g:(g + 1) * cin_g,
                     g * cout_g:(g + 1) * cout_g].set(
            jnp.transpose(w[g * cout_g:(g + 1) * cout_g, :, k]))
    return blk


def _fused_layer1_weight(w_lsc, b_lsc, branches, ksize):
    """LSC Linear folded into the first grouped conv of BOTH branches.
    Result: (ksize*LANE, sum(C_out_branch)).  Row `c_in` of every tap block
    carries the LSC bias (matched by the ones-column appended to x)."""
    c_in = w_lsc.shape[0]
    c_out_total = sum(l["w"].shape[0] for l in branches)
    w = jnp.zeros((ksize * LANE, c_out_total), jnp.float32)
    pad = ksize // 2
    col = 0
    for layer in branches:
        ks = layer["w"].shape[2]
        for k in range(ks):
            tap = _tap_block(layer["w"], layer["groups"], k)      # (c_pre, c_o)
            folded = jnp.concatenate([w_lsc @ tap, b_lsc[None, :] @ tap], 0)
            kg = (k - ks // 2) + pad
            w = w.at[kg * LANE:kg * LANE + c_in + 1,
                     col:col + tap.shape[1]].set(folded)
        col += layer["w"].shape[0]
    return w


def _fused_layer2_weight(branches, ksize):
    """Both branches' second grouped conv as one block-diagonal im2col weight:
    (ksize * sum(C_in_branch), sum(C_out_branch))."""
    c_ins = [l["w"].shape[1] * l["groups"] for l in branches]
    c_in = sum(c_ins)
    c_out_total = sum(l["w"].shape[0] for l in branches)
    pad = ksize // 2
    w = jnp.zeros((ksize * c_in, c_out_total), jnp.float32)
    r0 = c0 = 0
    for layer, ci in zip(branches, c_ins):
        ks = layer["w"].shape[2]
        for k in range(ks):
            tap = _tap_block(layer["w"], layer["groups"], k)
            kg = (k - ks // 2) + pad
            w = w.at[kg * c_in + r0:kg * c_in + r0 + ci,
                     c0:c0 + tap.shape[1]].set(tap)
        r0 += ci
        c0 += layer["w"].shape[0]
    return w


def _permute_fc1_rows(w_fc1, n_branches, c_branch, n_f):
    """Reorder fc1 rows from the PyTorch flatten order (branch, channel, time)
    to the kernel's feature order (time, branch, channel)."""
    idx = []
    for t in range(n_f):
        for br in range(n_branches):
            for c in range(c_branch):
                idx.append(br * c_branch * n_f + c * n_f + t)
    return w_fc1[jnp.asarray(idx), :]


def _pack_misc(vectors):
    misc = jnp.zeros((MISC_ROWS, LANE), jnp.float32)
    for i, v in enumerate(vectors):
        misc = misc.at[i, :v.shape[0]].set(v.astype(jnp.float32))
    return misc


def prepare_params(params, *, sequence_length):
    small, large = params["small"], params["large"]
    assert len(small) == 2 and len(large) == 2
    ksize = max(small[0]["ksize"], large[0]["ksize"])   # small taps zero-padded
    n_f = sequence_length // 4
    c_last = small[-1]["w"].shape[0]
    nb_classes = params["fc3_w"].shape[1]

    w1 = _fused_layer1_weight(params["lsc_w"], params["lsc_b"],
                              [small[0], large[0]], ksize)
    w2 = _fused_layer2_weight([small[1], large[1]], ksize)
    w_fc1 = _permute_fc1_rows(params["fc1_w"], 2, c_last, n_f)
    w_fc3 = jnp.zeros((params["fc3_w"].shape[0], LANE), jnp.float32)
    w_fc3 = w_fc3.at[:, :nb_classes].set(params["fc3_w"])

    b1 = jnp.concatenate([small[0]["b"], large[0]["b"]])
    b2 = jnp.concatenate([small[1]["b"], large[1]["b"]])
    b3 = jnp.zeros((LANE,), jnp.float32).at[:nb_classes].set(params["fc3_b"])
    a1 = jnp.concatenate([jnp.full((small[0]["b"].shape[0],), small[0]["alpha"]),
                          jnp.full((large[0]["b"].shape[0],), large[0]["alpha"])])
    a2 = jnp.concatenate([jnp.full((small[1]["b"].shape[0],), small[1]["alpha"]),
                          jnp.full((large[1]["b"].shape[0],), large[1]["alpha"])])
    af1 = jnp.full((params["fc1_b"].shape[0],), params["fc1_alpha"])
    af2 = jnp.full((params["fc2_b"].shape[0],), params["fc2_alpha"])
    misc = _pack_misc([b1, b2, params["fc1_b"], params["fc2_b"], b3,
                       a1, a2, af1, af2])

    bf16 = jnp.bfloat16
    return {
        "w1": w1.astype(bf16), "w2": w2.astype(bf16),
        "w_fc1": w_fc1.astype(bf16), "w_fc2": params["fc2_w"].astype(bf16),
        "w_fc3": w_fc3.astype(bf16),
        "misc": misc, "ksize": int(ksize), "nb_classes": int(nb_classes),
    }


# ----------------------------------------------------------------------------
# Net.forward (single fused Pallas call, batch-tiled parallel grid)
# ----------------------------------------------------------------------------
def net_forward(x, fp, *, batch_tile=None):
    n, seq_len, c_in = x.shape
    assert seq_len % 4 == 0, "two AvgPool1d(2) stages need seq_len % 4 == 0"
    assert c_in + 1 <= LANE
    bt = n if batch_tile is None else min(batch_tile, n)
    assert n % bt == 0, "batch must be divisible by the batch tile"
    grid = (n // bt,)

    # Lane-pad the input once: [x | 1 | 0 ...] so the LSC bias folds into the
    # fused layer-1 weight and the first matmul operand is lane-dense.
    ones = jnp.ones((n, seq_len, 1), jnp.float32)
    zeros = jnp.zeros((n, seq_len, LANE - c_in - 1), jnp.float32)
    x_rows = jnp.concatenate([x.astype(jnp.float32), ones, zeros],
                             axis=-1).reshape(n * seq_len, LANE)

    weights = (fp["w1"], fp["w2"], fp["w_fc1"], fp["w_fc2"], fp["w_fc3"])
    kern = functools.partial(_fused_net_kernel, bt=bt, seq_len=seq_len,
                             ksize=fp["ksize"])

    out = pl.pallas_call(
        kern,
        out_shape=jax.ShapeDtypeStruct((n // bt, bt, LANE), jnp.float32),
        grid=grid,
        in_specs=[pl.BlockSpec((bt * seq_len, LANE), lambda i: (i, 0))]
        + [pl.BlockSpec(w.shape, lambda i: (0, 0)) for w in weights]
        + [pl.BlockSpec(fp["misc"].shape, lambda i: (0, 0))],
        out_specs=pl.BlockSpec((None, bt, LANE), lambda i: (i, 0, 0)),
        compiler_params=pltpu.CompilerParams(
            dimension_semantics=("parallel",),
            vmem_limit_bytes=32 * 1024 * 1024),
    )(x_rows, *weights, fp["misc"])

    return out.reshape(n, LANE)[:, :fp["nb_classes"]]


# ----------------------------------------------------------------------------
# Pure-JAX reference (PyTorch-layout params) for the correctness check
# ----------------------------------------------------------------------------
def _prelu_ref(x, a):
    return jnp.maximum(x, 0.0) + a * jnp.minimum(x, 0.0)


def net_forward_ref(x, params):
    n = x.shape[0]
    h = x @ params["lsc_w"] + params["lsc_b"]              # (n, L, c_pre)
    h = jnp.transpose(h, (0, 2, 1))                        # (n, c_pre, L)
    outs = []
    for branch in ("small", "large"):
        y = h
        for layer in params[branch]:
            pad = layer["ksize"] // 2
            y = jax.lax.conv_general_dilated(
                y, layer["w"], window_strides=(1,), padding=[(pad, pad)],
                dimension_numbers=("NCH", "OIH", "NCH"),
                feature_group_count=layer["groups"],
            ) + layer["b"][None, :, None]
            y = _prelu_ref(y, layer["alpha"])
            b_, c_, l_ = y.shape
            y = y.reshape(b_, c_, l_ // 2, 2).mean(-1)     # AvgPool1d(2)
        outs.append(y)
    y = jnp.concatenate(outs, axis=1).reshape(n, -1)       # PyTorch flatten
    y = _prelu_ref(y @ params["fc1_w"] + params["fc1_b"], params["fc1_alpha"])
    y = _prelu_ref(y @ params["fc2_w"] + params["fc2_b"], params["fc2_alpha"])
    return y @ params["fc3_w"] + params["fc3_b"]


# ----------------------------------------------------------------------------
# Deterministic parameter init + run
# ----------------------------------------------------------------------------
def make_params(key):
    keys = iter(jax.random.split(key, 32))

    def init(shape, fan_in):
        return jax.random.normal(next(keys), shape, jnp.float32) / (fan_in ** 0.5)

    def alpha():
        return 0.1 + 0.3 * jax.random.uniform(next(keys), (), jnp.float32)

    c_in, c_pre = 66, 16
    conv_cfg = [(16, 4), (32, 4)]                      # (out_channels, groups)
    params = {"lsc_w": init((c_in, c_pre), c_in),
              "lsc_b": init((c_pre,), c_in)}
    for branch, ksize in (("small", 3), ("large", 7)):
        layers, ch = [], c_pre
        for out_ch, g in conv_cfg:
            fan = (ch // g) * ksize
            layers.append({"w": init((out_ch, ch // g, ksize), fan),
                           "b": init((out_ch,), fan),
                           "groups": g, "ksize": ksize, "alpha": alpha()})
            ch = out_ch
        params[branch] = layers

    seq_len = 16
    nb_feat = 2 * conv_cfg[-1][0] * (seq_len // 4)     # 256
    fc_hidden, nb_classes = [64, 32], 14
    params["fc1_w"] = init((nb_feat, fc_hidden[0]), nb_feat)
    params["fc1_b"] = init((fc_hidden[0],), nb_feat)
    params["fc1_alpha"] = alpha()
    params["fc2_w"] = init((fc_hidden[0], fc_hidden[1]), fc_hidden[0])
    params["fc2_b"] = init((fc_hidden[1],), fc_hidden[0])
    params["fc2_alpha"] = alpha()
    params["fc3_w"] = init((fc_hidden[1], nb_classes), fc_hidden[1])
    params["fc3_b"] = init((nb_classes,), fc_hidden[1])
    return params


if __name__ == "__main__":
    root = jax.random.PRNGKey(0)
    k_param, k_x = jax.random.split(root)
    params = make_params(k_param)
    fp = prepare_params(params, sequence_length=16)

    # Input: (N, L_in, C_in) = (4, 16, 66) -- 66 = 22 hand joints * 3 coords.
    x = jax.random.normal(k_x, (4, 16, 66), jnp.float32)

    out = jax.block_until_ready(net_forward(x, fp, batch_tile=2))
    ref = net_forward_ref(x, params)

    assert out.shape == (4, 14), out.shape
    if not jnp.allclose(out, ref, atol=2e-2, rtol=2e-2):
        err = float(jnp.max(jnp.abs(out - ref)))
        raise RuntimeError(f"Pallas output != reference (max abs err {err})")
    print("KERNEL_OK")
</pallas_src>

<mosaic_0001>
module attributes {stable_mosaic.version = 11 : i64} {
  func.func @_fused_net_kernel(%arg0: i32, %arg1: memref<32x128xf32, #tpu.memory_space<vmem>>, %arg2: memref<896x32xbf16, #tpu.memory_space<vmem>>, %arg3: memref<224x64xbf16, #tpu.memory_space<vmem>>, %arg4: memref<256x64xbf16, #tpu.memory_space<vmem>>, %arg5: memref<64x32xbf16, #tpu.memory_space<vmem>>, %arg6: memref<32x128xbf16, #tpu.memory_space<vmem>>, %arg7: memref<16x128xf32, #tpu.memory_space<vmem>>, %arg8: memref<1x2x128xf32, #tpu.memory_space<vmem>>) attributes {dimension_semantics = [#tpu.dimension_semantics<parallel>], iteration_bounds = array<i64: 2>, scalar_prefetch = 0 : i64, scratch_operands = 0 : i64, tpu.core_type = #tpu.core_type<tc>, window_params = [{transform_indices = @transform_0, window_bounds = array<i64: 32, 128>}, {pipeline_mode = #tpu.pipeline_mode<synchronous>, transform_indices = @transform_1, window_bounds = array<i64: 896, 32>}, {pipeline_mode = #tpu.pipeline_mode<synchronous>, transform_indices = @transform_2, window_bounds = array<i64: 224, 64>}, {pipeline_mode = #tpu.pipeline_mode<synchronous>, transform_indices = @transform_3, window_bounds = array<i64: 256, 64>}, {pipeline_mode = #tpu.pipeline_mode<synchronous>, transform_indices = @transform_4, window_bounds = array<i64: 64, 32>}, {pipeline_mode = #tpu.pipeline_mode<synchronous>, transform_indices = @transform_5, window_bounds = array<i64: 32, 128>}, {pipeline_mode = #tpu.pipeline_mode<synchronous>, transform_indices = @transform_6, window_bounds = array<i64: 16, 128>}, {transform_indices = @transform_7, window_bounds = array<i64: 1, 2, 128>}]} {
    %c0 = arith.constant 0 : index
    %c0_0 = arith.constant 0 : index
    %0 = vector.load %arg1[%c0, %c0_0] : memref<32x128xf32, #tpu.memory_space<vmem>>, vector<32x128xf32>
    %1 = tpu.iota {dimensions = array<i32: 0>} : vector<32x1xi32>
    %c16_i32 = arith.constant 16 : i32
    %c0_i32 = arith.constant 0 : i32
    %2 = arith.cmpi eq, %c16_i32, %c0_i32 : i32
    %c1_i32 = arith.constant 1 : i32
    %3 = arith.select %2, %c1_i32, %c16_i32 : i32
    %4 = vector.broadcast %3 : i32 to vector<32x1xi32>
    %5 = arith.remsi %1, %4 : vector<32x1xi32>
    %c0_i32_1 = arith.constant 0 : i32
    %6 = vector.broadcast %c0_i32_1 : i32 to vector<32x1xi32>
    %7 = arith.cmpi ne, %5, %6 : vector<32x1xi32>
    %c0_i32_2 = arith.constant 0 : i32
    %8 = vector.broadcast %c0_i32_2 : i32 to vector<32x1xi32>
    %9 = arith.cmpi slt, %5, %8 : vector<32x1xi32>
    %c0_i32_3 = arith.constant 0 : i32
    %10 = arith.cmpi slt, %3, %c0_i32_3 : i32
    %11 = vector.broadcast %10 : i1 to vector<32x1xi1>
    %12 = vector.broadcast %11 : vector<32x1xi1> to vector<32x1xi1>
    %13 = arith.xori %9, %12 : vector<32x1xi1>
    %14 = arith.andi %13, %7 : vector<32x1xi1>
    %15 = vector.broadcast %3 : i32 to vector<32x1xi32>
    %16 = arith.addi %5, %15 : vector<32x1xi32>
    %17 = arith.select %14, %16, %5 : vector<32x1xi1>, vector<32x1xi32>
    %c-3_i32 = arith.constant -3 : i32
    %18 = vector.broadcast %c-3_i32 : i32 to vector<32x1xi32>
    %19 = arith.addi %17, %18 : vector<32x1xi32>
    %c0_i32_4 = arith.constant 0 : i32
    %20 = vector.broadcast %c0_i32_4 : i32 to vector<32x1xi32>
    %21 = arith.cmpi sge, %19, %20 : vector<32x1xi32>
    %c-3_i32_5 = arith.constant -3 : i32
    %22 = vector.broadcast %c-3_i32_5 : i32 to vector<32x1xi32>
    %23 = arith.addi %17, %22 : vector<32x1xi32>
    %c16_i32_6 = arith.constant 16 : i32
    %24 = vector.broadcast %c16_i32_6 : i32 to vector<32x1xi32>
    %25 = arith.cmpi slt, %23, %24 : vector<32x1xi32>
    %26 = arith.andi %21, %25 : vector<32x1xi1>
    %cst = arith.constant 0.000000e+00 : f32
    %27 = vector.broadcast %cst : f32 to vector<3x128xf32>
    %28 = vector.extract_strided_slice %0 {offsets = [0, 0], sizes = [29, 128], strides = [1, 1]} : vector<32x128xf32> to vector<29x128xf32>
    %29 = tpu.concatenate %27, %28 in 0 : vector<3x128xf32>, vector<29x128xf32> -> vector<32x128xf32>
    %cst_7 = arith.constant 0.000000e+00 : f32
    %30 = vector.shape_cast %26 : vector<32x1xi1> to vector<32x1xi1>
    %31 = vector.broadcast %30 : vector<32x1xi1> to vector<32x128xi1>
    %32 = vector.broadcast %cst_7 : f32 to vector<32x128xf32>
    %33 = arith.select %31, %29, %32 : vector<32x128xi1>, vector<32x128xf32>
    %c-2_i32 = arith.constant -2 : i32
    %34 = vector.broadcast %c-2_i32 : i32 to vector<32x1xi32>
    %35 = arith.addi %17, %34 : vector<32x1xi32>
    %c0_i32_8 = arith.constant 0 : i32
    %36 = vector.broadcast %c0_i32_8 : i32 to vector<32x1xi32>
    %37 = arith.cmpi sge, %35, %36 : vector<32x1xi32>
    %c-2_i32_9 = arith.constant -2 : i32
    %38 = vector.broadcast %c-2_i32_9 : i32 to vector<32x1xi32>
    %39 = arith.addi %17, %38 : vector<32x1xi32>
    %c16_i32_10 = arith.constant 16 : i32
    %40 = vector.broadcast %c16_i32_10 : i32 to vector<32x1xi32>
    %41 = arith.cmpi slt, %39, %40 : vector<32x1xi32>
    %42 = arith.andi %37, %41 : vector<32x1xi1>
    %cst_11 = arith.constant 0.000000e+00 : f32
    %43 = vector.broadcast %cst_11 : f32 to vector<2x128xf32>
    %44 = vector.extract_strided_slice %0 {offsets = [0, 0], sizes = [30, 128], strides = [1, 1]} : vector<32x128xf32> to vector<30x128xf32>
    %45 = tpu.concatenate %43, %44 in 0 : vector<2x128xf32>, vector<30x128xf32> -> vector<32x128xf32>
    %cst_12 = arith.constant 0.000000e+00 : f32
    %46 = vector.shape_cast %42 : vector<32x1xi1> to vector<32x1xi1>
    %47 = vector.broadcast %46 : vector<32x1xi1> to vector<32x128xi1>
    %48 = vector.broadcast %cst_12 : f32 to vector<32x128xf32>
    %49 = arith.select %47, %45, %48 : vector<32x128xi1>, vector<32x128xf32>
    %c-1_i32 = arith.constant -1 : i32
    %50 = vector.broadcast %c-1_i32 : i32 to vector<32x1xi32>
    %51 = arith.addi %17, %50 : vector<32x1xi32>
    %c0_i32_13 = arith.constant 0 : i32
    %52 = vector.broadcast %c0_i32_13 : i32 to vector<32x1xi32>
    %53 = arith.cmpi sge, %51, %52 : vector<32x1xi32>
    %c-1_i32_14 = arith.constant -1 : i32
    %54 = vector.broadcast %c-1_i32_14 : i32 to vector<32x1xi32>
    %55 = arith.addi %17, %54 : vector<32x1xi32>
    %c16_i32_15 = arith.constant 16 : i32
    %56 = vector.broadcast %c16_i32_15 : i32 to vector<32x1xi32>
    %57 = arith.cmpi slt, %55, %56 : vector<32x1xi32>
    %58 = arith.andi %53, %57 : vector<32x1xi1>
    %cst_16 = arith.constant 0.000000e+00 : f32
    %59 = vector.broadcast %cst_16 : f32 to vector<1x128xf32>
    %60 = vector.extract_strided_slice %0 {offsets = [0, 0], sizes = [31, 128], strides = [1, 1]} : vector<32x128xf32> to vector<31x128xf32>
    %61 = tpu.concatenate %59, %60 in 0 : vector<1x128xf32>, vector<31x128xf32> -> vector<32x128xf32>
    %cst_17 = arith.constant 0.000000e+00 : f32
    %62 = vector.shape_cast %58 : vector<32x1xi1> to vector<32x1xi1>
    %63 = vector.broadcast %62 : vector<32x1xi1> to vector<32x128xi1>
    %64 = vector.broadcast %cst_17 : f32 to vector<32x128xf32>
    %65 = arith.select %63, %61, %64 : vector<32x128xi1>, vector<32x128xf32>
    %c0_i32_18 = arith.constant 0 : i32
    %66 = vector.broadcast %c0_i32_18 : i32 to vector<32x1xi32>
    %67 = arith.addi %17, %66 : vector<32x1xi32>
    %c0_i32_19 = arith.constant 0 : i32
    %68 = vector.broadcast %c0_i32_19 : i32 to vector<32x1xi32>
    %69 = arith.cmpi sge, %67, %68 : vector<32x1xi32>
    %c0_i32_20 = arith.constant 0 : i32
    %70 = vector.broadcast %c0_i32_20 : i32 to vector<32x1xi32>
    %71 = arith.addi %17, %70 : vector<32x1xi32>
    %c16_i32_21 = arith.constant 16 : i32
    %72 = vector.broadcast %c16_i32_21 : i32 to vector<32x1xi32>
    %73 = arith.cmpi slt, %71, %72 : vector<32x1xi32>
    %74 = arith.andi %69, %73 : vector<32x1xi1>
    %cst_22 = arith.constant 0.000000e+00 : f32
    %75 = vector.shape_cast %74 : vector<32x1xi1> to vector<32x1xi1>
    %76 = vector.broadcast %75 : vector<32x1xi1> to vector<32x128xi1>
    %77 = vector.broadcast %cst_22 : f32 to vector<32x128xf32>
    %78 = arith.select %76, %0, %77 : vector<32x128xi1>, vector<32x128xf32>
    %c1_i32_23 = arith.constant 1 : i32
    %79 = vector.broadcast %c1_i32_23 : i32 to vector<32x1xi32>
    %80 = arith.addi %17, %79 : vector<32x1xi32>
    %c0_i32_24 = arith.constant 0 : i32
    %81 = vector.broadcast %c0_i32_24 : i32 to vector<32x1xi32>
    %82 = arith.cmpi sge, %80, %81 : vector<32x1xi32>
    %c1_i32_25 = arith.constant 1 : i32
    %83 = vector.broadcast %c1_i32_25 : i32 to vector<32x1xi32>
    %84 = arith.addi %17, %83 : vector<32x1xi32>
    %c16_i32_26 = arith.constant 16 : i32
    %85 = vector.broadcast %c16_i32_26 : i32 to vector<32x1xi32>
    %86 = arith.cmpi slt, %84, %85 : vector<32x1xi32>
    %87 = arith.andi %82, %86 : vector<32x1xi1>
    %cst_27 = arith.constant 0.000000e+00 : f32
    %88 = vector.broadcast %cst_27 : f32 to vector<1x128xf32>
    %89 = vector.extract_strided_slice %0 {offsets = [1, 0], sizes = [31, 128], strides = [1, 1]} : vector<32x128xf32> to vector<31x128xf32>
    %90 = tpu.concatenate %89, %88 in 0 : vector<31x128xf32>, vector<1x128xf32> -> vector<32x128xf32>
    %cst_28 = arith.constant 0.000000e+00 : f32
    %91 = vector.shape_cast %87 : vector<32x1xi1> to vector<32x1xi1>
    %92 = vector.broadcast %91 : vector<32x1xi1> to vector<32x128xi1>
    %93 = vector.broadcast %cst_28 : f32 to vector<32x128xf32>
    %94 = arith.select %92, %90, %93 : vector<32x128xi1>, vector<32x128xf32>
    %c2_i32 = arith.constant 2 : i32
    %95 = vector.broadcast %c2_i32 : i32 to vector<32x1xi32>
    %96 = arith.addi %17, %95 : vector<32x1xi32>
    %c0_i32_29 = arith.constant 0 : i32
    %97 = vector.broadcast %c0_i32_29 : i32 to vector<32x1xi32>
    %98 = arith.cmpi sge, %96, %97 : vector<32x1xi32>
    %c2_i32_30 = arith.constant 2 : i32
    %99 = vector.broadcast %c2_i32_30 : i32 to vector<32x1xi32>
    %100 = arith.addi %17, %99 : vector<32x1xi32>
    %c16_i32_31 = arith.constant 16 : i32
    %101 = vector.broadcast %c16_i32_31 : i32 to vector<32x1xi32>
    %102 = arith.cmpi slt, %100, %101 : vector<32x1xi32>
    %103 = arith.andi %98, %102 : vector<32x1xi1>
    %cst_32 = arith.constant 0.000000e+00 : f32
    %104 = vector.broadcast %cst_32 : f32 to vector<2x128xf32>
    %105 = vector.extract_strided_slice %0 {offsets = [2, 0], sizes = [30, 128], strides = [1, 1]} : vector<32x128xf32> to vector<30x128xf32>
    %106 = tpu.concatenate %105, %104 in 0 : vector<30x128xf32>, vector<2x128xf32> -> vector<32x128xf32>
    %cst_33 = arith.constant 0.000000e+00 : f32
    %107 = vector.shape_cast %103 : vector<32x1xi1> to vector<32x1xi1>
    %108 = vector.broadcast %107 : vector<32x1xi1> to vector<32x128xi1>
    %109 = vector.broadcast %cst_33 : f32 to vector<32x128xf32>
    %110 = arith.select %108, %106, %109 : vector<32x128xi1>, vector<32x128xf32>
    %c3_i32 = arith.constant 3 : i32
    %111 = vector.broadcast %c3_i32 : i32 to vector<32x1xi32>
    %112 = arith.addi %17, %111 : vector<32x1xi32>
    %c0_i32_34 = arith.constant 0 : i32
    %113 = vector.broadcast %c0_i32_34 : i32 to vector<32x1xi32>
    %114 = arith.cmpi sge, %112, %113 : vector<32x1xi32>
    %c3_i32_35 = arith.constant 3 : i32
    %115 = vector.broadcast %c3_i32_35 : i32 to vector<32x1xi32>
    %116 = arith.addi %17, %115 : vector<32x1xi32>
    %c16_i32_36 = arith.constant 16 : i32
    %117 = vector.broadcast %c16_i32_36 : i32 to vector<32x1xi32>
    %118 = arith.cmpi slt, %116, %117 : vector<32x1xi32>
    %119 = arith.andi %114, %118 : vector<32x1xi1>
    %cst_37 = arith.constant 0.000000e+00 : f32
    %120 = vector.broadcast %cst_37 : f32 to vector<3x128xf32>
    %121 = vector.extract_strided_slice %0 {offsets = [3, 0], sizes = [29, 128], strides = [1, 1]} : vector<32x128xf32> to vector<29x128xf32>
    %122 = tpu.concatenate %121, %120 in 0 : vector<29x128xf32>, vector<3x128xf32> -> vector<32x128xf32>
    %cst_38 = arith.constant 0.000000e+00 : f32
    %123 = vector.shape_cast %119 : vector<32x1xi1> to vector<32x1xi1>
    %124 = vector.broadcast %123 : vector<32x1xi1> to vector<32x128xi1>
    %125 = vector.broadcast %cst_38 : f32 to vector<32x128xf32>
    %126 = arith.select %124, %122, %125 : vector<32x128xi1>, vector<32x128xf32>
    %127 = tpu.concatenate %33, %49, %65, %78, %94, %110, %126 in 1 : vector<32x128xf32>, vector<32x128xf32>, vector<32x128xf32>, vector<32x128xf32>, vector<32x128xf32>, vector<32x128xf32>, vector<32x128xf32> -> vector<32x896xf32>
    %c0_39 = arith.constant 0 : index
    %c0_40 = arith.constant 0 : index
    %128 = vector.load %arg2[%c0_39, %c0_40] : memref<896x32xbf16, #tpu.memory_space<vmem>>, vector<896x32xbf16>
    %129 = arith.truncf %127 : vector<32x896xf32> to vector<32x896xbf16>
    %cst_41 = arith.constant dense<0.000000e+00> : vector<32x32xf32>
    %130 = tpu.matmul %129, %128, %cst_41 {dimension_numbers = #tpu.dot_dimension_numbers<[1], [0], [0], [1], [0, 0, 1, 1], [], []>} : vector<32x896xbf16>, vector<896x32xbf16>, vector<32x32xf32> -> vector<32x32xf32>
    %c0_42 = arith.constant 0 : index
    %c0_43 = arith.constant 0 : index
    %131 = vector.load %arg7[%c0_42, %c0_43] : memref<16x128xf32, #tpu.memory_space<vmem>>, vector<1x32xf32>
    %132 = vector.broadcast %131 : vector<1x32xf32> to vector<32x32xf32>
    %133 = arith.addf %130, %132 : vector<32x32xf32>
    %c5 = arith.constant 5 : index
    %c0_44 = arith.constant 0 : index
    %134 = vector.load %arg7[%c5, %c0_44] : memref<16x128xf32, #tpu.memory_space<vmem>>, vector<1x32xf32>
    %cst_45 = arith.constant 0.000000e+00 : f32
    %135 = vector.broadcast %cst_45 : f32 to vector<32x32xf32>
    %136 = arith.maximumf %133, %135 : vector<32x32xf32>
    %cst_46 = arith.constant 0.000000e+00 : f32
    %137 = vector.broadcast %cst_46 : f32 to vector<32x32xf32>
    %138 = arith.minimumf %133, %137 : vector<32x32xf32>
    %139 = vector.broadcast %134 : vector<1x32xf32> to vector<32x32xf32>
    %140 = arith.mulf %139, %138 : vector<32x32xf32>
    %141 = arith.addf %136, %140 : vector<32x32xf32>
    %142 = vector.shape_cast %141 : vector<32x32xf32> to vector<16x2x32xf32>
    %143 = vector.extract_strided_slice %142 {offsets = [0, 0, 0], sizes = [16, 1, 32], strides = [1, 1, 1]} : vector<16x2x32xf32> to vector<16x1x32xf32>
    %144 = vector.shape_cast %143 : vector<16x1x32xf32> to vector<16x32xf32>
    %145 = vector.extract_strided_slice %142 {offsets = [0, 1, 0], sizes = [16, 1, 32], strides = [1, 1, 1]} : vector<16x2x32xf32> to vector<16x1x32xf32>
    %146 = vector.shape_cast %145 : vector<16x1x32xf32> to vector<16x32xf32>
    %147 = arith.addf %144, %146 : vector<16x32xf32>
    %cst_47 = arith.constant 5.000000e-01 : f32
    %148 = vector.broadcast %cst_47 : f32 to vector<16x32xf32>
    %149 = arith.mulf %148, %147 : vector<16x32xf32>
    %150 = tpu.iota {dimensions = array<i32: 0>} : vector<16x1xi32>
    %c8_i32 = arith.constant 8 : i32
    %c0_i32_48 = arith.constant 0 : i32
    %151 = arith.cmpi eq, %c8_i32, %c0_i32_48 : i32
    %c1_i32_49 = arith.constant 1 : i32
    %152 = arith.select %151, %c1_i32_49, %c8_i32 : i32
    %153 = vector.broadcast %152 : i32 to vector<16x1xi32>
    %154 = arith.remsi %150, %153 : vector<16x1xi32>
    %c0_i32_50 = arith.constant 0 : i32
    %155 = vector.broadcast %c0_i32_50 : i32 to vector<16x1xi32>
    %156 = arith.cmpi ne, %154, %155 : vector<16x1xi32>
    %c0_i32_51 = arith.constant 0 : i32
    %157 = vector.broadcast %c0_i32_51 : i32 to vector<16x1xi32>
    %158 = arith.cmpi slt, %154, %157 : vector<16x1xi32>
    %c0_i32_52 = arith.constant 0 : i32
    %159 = arith.cmpi slt, %152, %c0_i32_52 : i32
    %160 = vector.broadcast %159 : i1 to vector<16x1xi1>
    %161 = vector.broadcast %160 : vector<16x1xi1> to vector<16x1xi1>
    %162 = arith.xori %158, %161 : vector<16x1xi1>
    %163 = arith.andi %162, %156 : vector<16x1xi1>
    %164 = vector.broadcast %152 : i32 to vector<16x1xi32>
    %165 = arith.addi %154, %164 : vector<16x1xi32>
    %166 = arith.select %163, %165, %154 : vector<16x1xi1>, vector<16x1xi32>
    %c-3_i32_53 = arith.constant -3 : i32
    %167 = vector.broadcast %c-3_i32_53 : i32 to vector<16x1xi32>
    %168 = arith.addi %166, %167 : vector<16x1xi32>
    %c0_i32_54 = arith.constant 0 : i32
    %169 = vector.broadcast %c0_i32_54 : i32 to vector<16x1xi32>
    %170 = arith.cmpi sge, %168, %169 : vector<16x1xi32>
    %c-3_i32_55 = arith.constant -3 : i32
    %171 = vector.broadcast %c-3_i32_55 : i32 to vector<16x1xi32>
    %172 = arith.addi %166, %171 : vector<16x1xi32>
    %c8_i32_56 = arith.constant 8 : i32
    %173 = vector.broadcast %c8_i32_56 : i32 to vector<16x1xi32>
    %174 = arith.cmpi slt, %172, %173 : vector<16x1xi32>
    %175 = arith.andi %170, %174 : vector<16x1xi1>
    %cst_57 = arith.constant 0.000000e+00 : f32
    %176 = vector.broadcast %cst_57 : f32 to vector<3x32xf32>
    %177 = vector.extract_strided_slice %149 {offsets = [0, 0], sizes = [13, 32], strides = [1, 1]} : vector<16x32xf32> to vector<13x32xf32>
    %178 = tpu.concatenate %176, %177 in 0 : vector<3x32xf32>, vector<13x32xf32> -> vector<16x32xf32>
    %cst_58 = arith.constant 0.000000e+00 : f32
    %179 = vector.shape_cast %175 : vector<16x1xi1> to vector<16x1xi1>
    %180 = vector.broadcast %179 : vector<16x1xi1> to vector<16x32xi1>
    %181 = vector.broadcast %cst_58 : f32 to vector<16x32xf32>
    %182 = arith.select %180, %178, %181 : vector<16x32xi1>, vector<16x32xf32>
    %c-2_i32_59 = arith.constant -2 : i32
    %183 = vector.broadcast %c-2_i32_59 : i32 to vector<16x1xi32>
    %184 = arith.addi %166, %183 : vector<16x1xi32>
    %c0_i32_60 = arith.constant 0 : i32
    %185 = vector.broadcast %c0_i32_60 : i32 to vector<16x1xi32>
    %186 = arith.cmpi sge, %184, %185 : vector<16x1xi32>
    %c-2_i32_61 = arith.constant -2 : i32
    %187 = vector.broadcast %c-2_i32_61 : i32 to vector<16x1xi32>
    %188 = arith.addi %166, %187 : vector<16x1xi32>
    %c8_i32_62 = arith.constant 8 : i32
    %189 = vector.broadcast %c8_i32_62 : i32 to vector<16x1xi32>
    %190 = arith.cmpi slt, %188, %189 : vector<16x1xi32>
    %191 = arith.andi %186, %190 : vector<16x1xi1>
    %cst_63 = arith.constant 0.000000e+00 : f32
    %192 = vector.broadcast %cst_63 : f32 to vector<2x32xf32>
    %193 = vector.extract_strided_slice %149 {offsets = [0, 0], sizes = [14, 32], strides = [1, 1]} : vector<16x32xf32> to vector<14x32xf32>
    %194 = tpu.concatenate %192, %193 in 0 : vector<2x32xf32>, vector<14x32xf32> -> vector<16x32xf32>
    %cst_64 = arith.constant 0.000000e+00 : f32
    %195 = vector.shape_cast %191 : vector<16x1xi1> to vector<16x1xi1>
    %196 = vector.broadcast %195 : vector<16x1xi1> to vector<16x32xi1>
    %197 = vector.broadcast %cst_64 : f32 to vector<16x32xf32>
    %198 = arith.select %196, %194, %197 : vector<16x32xi1>, vector<16x32xf32>
    %c-1_i32_65 = arith.constant -1 : i32
    %199 = vector.broadcast %c-1_i32_65 : i32 to vector<16x1xi32>
    %200 = arith.addi %166, %199 : vector<16x1xi32>
    %c0_i32_66 = arith.constant 0 : i32
    %201 = vector.broadcast %c0_i32_66 : i32 to vector<16x1xi32>
    %202 = arith.cmpi sge, %200, %201 : vector<16x1xi32>
    %c-1_i32_67 = arith.constant -1 : i32
    %203 = vector.broadcast %c-1_i32_67 : i32 to vector<16x1xi32>
    %204 = arith.addi %166, %203 : vector<16x1xi32>
    %c8_i32_68 = arith.constant 8 : i32
    %205 = vector.broadcast %c8_i32_68 : i32 to vector<16x1xi32>
    %206 = arith.cmpi slt, %204, %205 : vector<16x1xi32>
    %207 = arith.andi %202, %206 : vector<16x1xi1>
    %cst_69 = arith.constant 0.000000e+00 : f32
    %208 = vector.broadcast %cst_69 : f32 to vector<1x32xf32>
    %209 = vector.extract_strided_slice %149 {offsets = [0, 0], sizes = [15, 32], strides = [1, 1]} : vector<16x32xf32> to vector<15x32xf32>
    %210 = tpu.concatenate %208, %209 in 0 : vector<1x32xf32>, vector<15x32xf32> -> vector<16x32xf32>
    %cst_70 = arith.constant 0.000000e+00 : f32
    %211 = vector.shape_cast %207 : vector<16x1xi1> to vector<16x1xi1>
    %212 = vector.broadcast %211 : vector<16x1xi1> to vector<16x32xi1>
    %213 = vector.broadcast %cst_70 : f32 to vector<16x32xf32>
    %214 = arith.select %212, %210, %213 : vector<16x32xi1>, vector<16x32xf32>
    %c0_i32_71 = arith.constant 0 : i32
    %215 = vector.broadcast %c0_i32_71 : i32 to vector<16x1xi32>
    %216 = arith.addi %166, %215 : vector<16x1xi32>
    %c0_i32_72 = arith.constant 0 : i32
    %217 = vector.broadcast %c0_i32_72 : i32 to vector<16x1xi32>
    %218 = arith.cmpi sge, %216, %217 : vector<16x1xi32>
    %c0_i32_73 = arith.constant 0 : i32
    %219 = vector.broadcast %c0_i32_73 : i32 to vector<16x1xi32>
    %220 = arith.addi %166, %219 : vector<16x1xi32>
    %c8_i32_74 = arith.constant 8 : i32
    %221 = vector.broadcast %c8_i32_74 : i32 to vector<16x1xi32>
    %222 = arith.cmpi slt, %220, %221 : vector<16x1xi32>
    %223 = arith.andi %218, %222 : vector<16x1xi1>
    %cst_75 = arith.constant 0.000000e+00 : f32
    %224 = vector.shape_cast %223 : vector<16x1xi1> to vector<16x1xi1>
    %225 = vector.broadcast %224 : vector<16x1xi1> to vector<16x32xi1>
    %226 = vector.broadcast %cst_75 : f32 to vector<16x32xf32>
    %227 = arith.select %225, %149, %226 : vector<16x32xi1>, vector<16x32xf32>
    %c1_i32_76 = arith.constant 1 : i32
    %228 = vector.broadcast %c1_i32_76 : i32 to vector<16x1xi32>
    %229 = arith.addi %166, %228 : vector<16x1xi32>
    %c0_i32_77 = arith.constant 0 : i32
    %230 = vector.broadcast %c0_i32_77 : i32 to vector<16x1xi32>
    %231 = arith.cmpi sge, %229, %230 : vector<16x1xi32>
    %c1_i32_78 = arith.constant 1 : i32
    %232 = vector.broadcast %c1_i32_78 : i32 to vector<16x1xi32>
    %233 = arith.addi %166, %232 : vector<16x1xi32>
    %c8_i32_79 = arith.constant 8 : i32
    %234 = vector.broadcast %c8_i32_79 : i32 to vector<16x1xi32>
    %235 = arith.cmpi slt, %233, %234 : vector<16x1xi32>
    %236 = arith.andi %231, %235 : vector<16x1xi1>
    %cst_80 = arith.constant 0.000000e+00 : f32
    %237 = vector.broadcast %cst_80 : f32 to vector<1x32xf32>
    %238 = vector.extract_strided_slice %149 {offsets = [1, 0], sizes = [15, 32], strides = [1, 1]} : vector<16x32xf32> to vector<15x32xf32>
    %239 = tpu.concatenate %238, %237 in 0 : vector<15x32xf32>, vector<1x32xf32> -> vector<16x32xf32>
    %cst_81 = arith.constant 0.000000e+00 : f32
    %240 = vector.shape_cast %236 : vector<16x1xi1> to vector<16x1xi1>
    %241 = vector.broadcast %240 : vector<16x1xi1> to vector<16x32xi1>
    %242 = vector.broadcast %cst_81 : f32 to vector<16x32xf32>
    %243 = arith.select %241, %239, %242 : vector<16x32xi1>, vector<16x32xf32>
    %c2_i32_82 = arith.constant 2 : i32
    %244 = vector.broadcast %c2_i32_82 : i32 to vector<16x1xi32>
    %245 = arith.addi %166, %244 : vector<16x1xi32>
    %c0_i32_83 = arith.constant 0 : i32
    %246 = vector.broadcast %c0_i32_83 : i32 to vector<16x1xi32>
    %247 = arith.cmpi sge, %245, %246 : vector<16x1xi32>
    %c2_i32_84 = arith.constant 2 : i32
    %248 = vector.broadcast %c2_i32_84 : i32 to vector<16x1xi32>
    %249 = arith.addi %166, %248 : vector<16x1xi32>
    %c8_i32_85 = arith.constant 8 : i32
    %250 = vector.broadcast %c8_i32_85 : i32 to vector<16x1xi32>
    %251 = arith.cmpi slt, %249, %250 : vector<16x1xi32>
    %252 = arith.andi %247, %251 : vector<16x1xi1>
    %cst_86 = arith.constant 0.000000e+00 : f32
    %253 = vector.broadcast %cst_86 : f32 to vector<2x32xf32>
    %254 = vector.extract_strided_slice %149 {offsets = [2, 0], sizes = [14, 32], strides = [1, 1]} : vector<16x32xf32> to vector<14x32xf32>
    %255 = tpu.concatenate %254, %253 in 0 : vector<14x32xf32>, vector<2x32xf32> -> vector<16x32xf32>
    %cst_87 = arith.constant 0.000000e+00 : f32
    %256 = vector.shape_cast %252 : vector<16x1xi1> to vector<16x1xi1>
    %257 = vector.broadcast %256 : vector<16x1xi1> to vector<16x32xi1>
    %258 = vector.broadcast %cst_87 : f32 to vector<16x32xf32>
    %259 = arith.select %257, %255, %258 : vector<16x32xi1>, vector<16x32xf32>
    %c3_i32_88 = arith.constant 3 : i32
    %260 = vector.broadcast %c3_i32_88 : i32 to vector<16x1xi32>
    %261 = arith.addi %166, %260 : vector<16x1xi32>
    %c0_i32_89 = arith.constant 0 : i32
    %262 = vector.broadcast %c0_i32_89 : i32 to vector<16x1xi32>
    %263 = arith.cmpi sge, %261, %262 : vector<16x1xi32>
    %c3_i32_90 = arith.constant 3 : i32
    %264 = vector.broadcast %c3_i32_90 : i32 to vector<16x1xi32>
    %265 = arith.addi %166, %264 : vector<16x1xi32>
    %c8_i32_91 = arith.constant 8 : i32
    %266 = vector.broadcast %c8_i32_91 : i32 to vector<16x1xi32>
    %267 = arith.cmpi slt, %265, %266 : vector<16x1xi32>
    %268 = arith.andi %263, %267 : vector<16x1xi1>
    %cst_92 = arith.constant 0.000000e+00 : f32
    %269 = vector.broadcast %cst_92 : f32 to vector<3x32xf32>
    %270 = vector.extract_strided_slice %149 {offsets = [3, 0], sizes = [13, 32], strides = [1, 1]} : vector<16x32xf32> to vector<13x32xf32>
    %271 = tpu.concatenate %270, %269 in 0 : vector<13x32xf32>, vector<3x32xf32> -> vector<16x32xf32>
    %cst_93 = arith.constant 0.000000e+00 : f32
    %272 = vector.shape_cast %268 : vector<16x1xi1> to vector<16x1xi1>
    %273 = vector.broadcast %272 : vector<16x1xi1> to vector<16x32xi1>
    %274 = vector.broadcast %cst_93 : f32 to vector<16x32xf32>
    %275 = arith.select %273, %271, %274 : vector<16x32xi1>, vector<16x32xf32>
    %276 = tpu.concatenate %182, %198, %214, %227, %243, %259, %275 in 1 : vector<16x32xf32>, vector<16x32xf32>, vector<16x32xf32>, vector<16x32xf32>, vector<16x32xf32>, vector<16x32xf32>, vector<16x32xf32> -> vector<16x224xf32>
    %c0_94 = arith.constant 0 : index
    %c0_95 = arith.constant 0 : index
    %277 = vector.load %arg3[%c0_94, %c0_95] : memref<224x64xbf16, #tpu.memory_space<vmem>>, vector<224x64xbf16>
    %278 = arith.truncf %276 : vector<16x224xf32> to vector<16x224xbf16>
    %cst_96 = arith.constant dense<0.000000e+00> : vector<16x64xf32>
    %279 = tpu.matmul %278, %277, %cst_96 {dimension_numbers = #tpu.dot_dimension_numbers<[1], [0], [0], [1], [0, 0, 1, 1], [], []>} : vector<16x224xbf16>, vector<224x64xbf16>, vector<16x64xf32> -> vector<16x64xf32>
    %c1 = arith.constant 1 : index
    %c0_97 = arith.constant 0 : index
    %280 = vector.load %arg7[%c1, %c0_97] : memref<16x128xf32, #tpu.memory_space<vmem>>, vector<1x64xf32>
    %281 = vector.broadcast %280 : vector<1x64xf32> to vector<16x64xf32>
    %282 = arith.addf %279, %281 : vector<16x64xf32>
    %c6 = arith.constant 6 : index
    %c0_98 = arith.constant 0 : index
    %283 = vector.load %arg7[%c6, %c0_98] : memref<16x128xf32, #tpu.memory_space<vmem>>, vector<1x64xf32>
    %cst_99 = arith.constant 0.000000e+00 : f32
    %284 = vector.broadcast %cst_99 : f32 to vector<16x64xf32>
    %285 = arith.maximumf %282, %284 : vector<16x64xf32>
    %cst_100 = arith.constant 0.000000e+00 : f32
    %286 = vector.broadcast %cst_100 : f32 to vector<16x64xf32>
    %287 = arith.minimumf %282, %286 : vector<16x64xf32>
    %288 = vector.broadcast %283 : vector<1x64xf32> to vector<16x64xf32>
    %289 = arith.mulf %288, %287 : vector<16x64xf32>
    %290 = arith.addf %285, %289 : vector<16x64xf32>
    %291 = vector.shape_cast %290 : vector<16x64xf32> to vector<8x2x64xf32>
    %292 = vector.extract_strided_slice %291 {offsets = [0, 0, 0], sizes = [8, 1, 64], strides = [1, 1, 1]} : vector<8x2x64xf32> to vector<8x1x64xf32>
    %293 = vector.shape_cast %292 : vector<8x1x64xf32> to vector<8x64xf32>
    %294 = vector.extract_strided_slice %291 {offsets = [0, 1, 0], sizes = [8, 1, 64], strides = [1, 1, 1]} : vector<8x2x64xf32> to vector<8x1x64xf32>
    %295 = vector.shape_cast %294 : vector<8x1x64xf32> to vector<8x64xf32>
    %296 = arith.addf %293, %295 : vector<8x64xf32>
    %cst_101 = arith.constant 5.000000e-01 : f32
    %297 = vector.broadcast %cst_101 : f32 to vector<8x64xf32>
    %298 = arith.mulf %297, %296 : vector<8x64xf32>
    %299 = vector.shape_cast %298 : vector<8x64xf32> to vector<2x4x64xf32>
    %300 = vector.extract_strided_slice %299 {offsets = [0, 0, 0], sizes = [2, 1, 64], strides = [1, 1, 1]} : vector<2x4x64xf32> to vector<2x1x64xf32>
    %301 = vector.shape_cast %300 : vector<2x1x64xf32> to vector<2x64xf32>
    %302 = vector.extract_strided_slice %299 {offsets = [0, 1, 0], sizes = [2, 1, 64], strides = [1, 1, 1]} : vector<2x4x64xf32> to vector<2x1x64xf32>
    %303 = vector.shape_cast %302 : vector<2x1x64xf32> to vector<2x64xf32>
    %304 = vector.extract_strided_slice %299 {offsets = [0, 2, 0], sizes = [2, 1, 64], strides = [1, 1, 1]} : vector<2x4x64xf32> to vector<2x1x64xf32>
    %305 = vector.shape_cast %304 : vector<2x1x64xf32> to vector<2x64xf32>
    %306 = vector.extract_strided_slice %299 {offsets = [0, 3, 0], sizes = [2, 1, 64], strides = [1, 1, 1]} : vector<2x4x64xf32> to vector<2x1x64xf32>
    %307 = vector.shape_cast %306 : vector<2x1x64xf32> to vector<2x64xf32>
    %308 = tpu.concatenate %301, %303, %305, %307 in 1 : vector<2x64xf32>, vector<2x64xf32>, vector<2x64xf32>, vector<2x64xf32> -> vector<2x256xf32>
    %c0_102 = arith.constant 0 : index
    %c0_103 = arith.constant 0 : index
    %309 = vector.load %arg4[%c0_102, %c0_103] : memref<256x64xbf16, #tpu.memory_space<vmem>>, vector<256x64xbf16>
    %310 = arith.truncf %308 : vector<2x256xf32> to vector<2x256xbf16>
    %cst_104 = arith.constant dense<0.000000e+00> : vector<2x64xf32>
    %311 = tpu.matmul %310, %309, %cst_104 {dimension_numbers = #tpu.dot_dimension_numbers<[1], [0], [0], [1], [0, 0, 1, 1], [], []>} : vector<2x256xbf16>, vector<256x64xbf16>, vector<2x64xf32> -> vector<2x64xf32>
    %c2 = arith.constant 2 : index
    %c0_105 = arith.constant 0 : index
    %312 = vector.load %arg7[%c2, %c0_105] : memref<16x128xf32, #tpu.memory_space<vmem>>, vector<1x64xf32>
    %313 = vector.broadcast %312 : vector<1x64xf32> to vector<2x64xf32>
    %314 = arith.addf %311, %313 : vector<2x64xf32>
    %c7 = arith.constant 7 : index
    %c0_106 = arith.constant 0 : index
    %315 = vector.load %arg7[%c7, %c0_106] : memref<16x128xf32, #tpu.memory_space<vmem>>, vector<1x64xf32>
    %cst_107 = arith.constant 0.000000e+00 : f32
    %316 = vector.broadcast %cst_107 : f32 to vector<2x64xf32>
    %317 = arith.maximumf %314, %316 : vector<2x64xf32>
    %cst_108 = arith.constant 0.000000e+00 : f32
    %318 = vector.broadcast %cst_108 : f32 to vector<2x64xf32>
    %319 = arith.minimumf %314, %318 : vector<2x64xf32>
    %320 = vector.broadcast %315 : vector<1x64xf32> to vector<2x64xf32>
    %321 = arith.mulf %320, %319 : vector<2x64xf32>
    %322 = arith.addf %317, %321 : vector<2x64xf32>
    %c0_109 = arith.constant 0 : index
    %c0_110 = arith.constant 0 : index
    %323 = vector.load %arg5[%c0_109, %c0_110] : memref<64x32xbf16, #tpu.memory_space<vmem>>, vector<64x32xbf16>
    %324 = arith.truncf %322 : vector<2x64xf32> to vector<2x64xbf16>
    %cst_111 = arith.constant dense<0.000000e+00> : vector<2x32xf32>
    %325 = tpu.matmul %324, %323, %cst_111 {dimension_numbers = #tpu.dot_dimension_numbers<[1], [0], [0], [1], [0, 0, 1, 1], [], []>} : vector<2x64xbf16>, vector<64x32xbf16>, vector<2x32xf32> -> vector<2x32xf32>
    %c3 = arith.constant 3 : index
    %c0_112 = arith.constant 0 : index
    %326 = vector.load %arg7[%c3, %c0_112] : memref<16x128xf32, #tpu.memory_space<vmem>>, vector<1x32xf32>
    %327 = vector.broadcast %326 : vector<1x32xf32> to vector<2x32xf32>
    %328 = arith.addf %325, %327 : vector<2x32xf32>
    %c8 = arith.constant 8 : index
    %c0_113 = arith.constant 0 : index
    %329 = vector.load %arg7[%c8, %c0_113] : memref<16x128xf32, #tpu.memory_space<vmem>>, vector<1x32xf32>
    %cst_114 = arith.constant 0.000000e+00 : f32
    %330 = vector.broadcast %cst_114 : f32 to vector<2x32xf32>
    %331 = arith.maximumf %328, %330 : vector<2x32xf32>
    %cst_115 = arith.constant 0.000000e+00 : f32
    %332 = vector.broadcast %cst_115 : f32 to vector<2x32xf32>
    %333 = arith.minimumf %328, %332 : vector<2x32xf32>
    %334 = vector.broadcast %329 : vector<1x32xf32> to vector<2x32xf32>
    %335 = arith.mulf %334, %333 : vector<2x32xf32>
    %336 = arith.addf %331, %335 : vector<2x32xf32>
    %c0_116 = arith.constant 0 : index
    %c0_117 = arith.constant 0 : index
    %337 = vector.load %arg6[%c0_116, %c0_117] : memref<32x128xbf16, #tpu.memory_space<vmem>>, vector<32x128xbf16>
    %338 = arith.truncf %336 : vector<2x32xf32> to vector<2x32xbf16>
    %cst_118 = arith.constant dense<0.000000e+00> : vector<2x128xf32>
    %339 = tpu.matmul %338, %337, %cst_118 {dimension_numbers = #tpu.dot_dimension_numbers<[1], [0], [0], [1], [0, 0, 1, 1], [], []>} : vector<2x32xbf16>, vector<32x128xbf16>, vector<2x128xf32> -> vector<2x128xf32>
    %c4 = arith.constant 4 : index
    %c0_119 = arith.constant 0 : index
    %340 = vector.load %arg7[%c4, %c0_119] : memref<16x128xf32, #tpu.memory_space<vmem>>, vector<1x128xf32>
    %341 = vector.broadcast %340 : vector<1x128xf32> to vector<2x128xf32>
    %342 = arith.addf %339, %341 : vector<2x128xf32>
    %c0_120 = arith.constant 0 : index
    %c0_121 = arith.constant 0 : index
    %c0_122 = arith.constant 0 : index
    %343 = vector.load %arg8[%c0_120, %c0_121, %c0_122] : memref<1x2x128xf32, #tpu.memory_space<vmem>>, vector<1x2x128xf32>
    %344 = vector.shape_cast %343 : vector<1x2x128xf32> to vector<2x128xf32>
    %345 = vector.shape_cast %342 : vector<2x128xf32> to vector<1x2x128xf32>
    tpu.vector_store %arg8[%c0_120, %c0_121, %c0_122], %345 {strides = array<i32>} : memref<1x2x128xf32, #tpu.memory_space<vmem>>, vector<1x2x128xf32>,
    return
  }
  func.func @transform_0(%arg0: i32) -> (i32, i32) {
    %c0_i32 = arith.constant 0 : i32
    %c0_i32_0 = arith.constant 0 : i32
    return %arg0, %c0_i32 : i32, i32
  }
  func.func @transform_1(%arg0: i32) -> (i32, i32) {
    %c0_i32 = arith.constant 0 : i32
    %c0_i32_0 = arith.constant 0 : i32
    %c0_i32_1 = arith.constant 0 : i32
    return %c0_i32, %c0_i32_0 : i32, i32
  }
  func.func @transform_2(%arg0: i32) -> (i32, i32) {
    %c0_i32 = arith.constant 0 : i32
    %c0_i32_0 = arith.constant 0 : i32
    %c0_i32_1 = arith.constant 0 : i32
    return %c0_i32, %c0_i32_0 : i32, i32
  }
  func.func @transform_3(%arg0: i32) -> (i32, i32) {
    %c0_i32 = arith.constant 0 : i32
    %c0_i32_0 = arith.constant 0 : i32
    %c0_i32_1 = arith.constant 0 : i32
    return %c0_i32, %c0_i32_0 : i32, i32
  }
  func.func @transform_4(%arg0: i32) -> (i32, i32) {
    %c0_i32 = arith.constant 0 : i32
    %c0_i32_0 = arith.constant 0 : i32
    %c0_i32_1 = arith.constant 0 : i32
    return %c0_i32, %c0_i32_0 : i32, i32
  }
  func.func @transform_5(%arg0: i32) -> (i32, i32) {
    %c0_i32 = arith.constant 0 : i32
    %c0_i32_0 = arith.constant 0 : i32
    %c0_i32_1 = arith.constant 0 : i32
    return %c0_i32, %c0_i32_0 : i32, i32
  }
  func.func @transform_6(%arg0: i32) -> (i32, i32) {
    %c0_i32 = arith.constant 0 : i32
    %c0_i32_0 = arith.constant 0 : i32
    %c0_i32_1 = arith.constant 0 : i32
    return %c0_i32, %c0_i32_0 : i32, i32
  }
  func.func @transform_7(%arg0: i32) -> (i32, i32, i32) {
    %c0_i32 = arith.constant 0 : i32
    %c0_i32_0 = arith.constant 0 : i32
    %c0_i32_1 = arith.constant 0 : i32
    return %arg0, %c0_i32, %c0_i32_0 : i32, i32, i32
  }
}

</mosaic_0001>

<bundles_post_ra>
// kernel: tpu_custom_call.1
= control target key start
LH: loop header
LB: loop body
LE: loop exit
PB: predicated region body
PF: predicated region fallthrough
CT: control target
= control target key end

     0   :  { %12 = vsyncpa [#allocation3], 0  ;;  %s4120_s0 = inlined_call_operand.vmem [shape: f32[64,128], index: 0, kind: input, shape index: {}]   ;;  %s4121_s1 = inlined_call_operand.vmem [shape: bf16[896,32], index: 1, kind: input, shape index: {}]   ;;  %s4122_s2 = inlined_call_operand.vmem [shape: bf16[224,64], index: 2, kind: input, shape index: {}]   ;;  %s4123_s3 = inlined_call_operand.vmem [shape: bf16[256,64], index: 3, kind: input, shape index: {}]   ;;  %s4124_s4 = inlined_call_operand.vmem [shape: bf16[64,32], index: 4, kind: input, shape index: {}]   ;;  %s4125_s5 = inlined_call_operand.vmem [shape: bf16[32,128], index: 5, kind: input, shape index: {}]   ;;  %s4126_s6 = inlined_call_operand.vmem [shape: f32[16,128], index: 6, kind: input, shape index: {}]   ;;  %s4127_s7 = inlined_call_operand.hbm [shape: f32[2,2,128], index: 7, kind: output, shape index: {}]  }
   0x1   :  { %14 = vsyncpa [#allocation3 + $0x1], 0  ;;  %s3177_s24 = smov 0   ;;  %s3179_s25 = smov 0  }
   0x2   :  { %s3181_s26 = smov 0   ;;  %s3183_s27 = smov 0  }
   0x3 LB: > { %s3198_s28 = sadd.s32 4294967295, %s3126_s27   ;;  %s2556_s29 = sadd.s32 4294967294, %s3126_s27   ;;  %s3126_s27 = sphi %s3183_s27, %s4153_s27   ;;  %s3122_s26 = sphi %s3181_s26, %s4152_s26   ;;  %s3118_s25 = sphi %s3179_s25, %s4151_s25   ;;  %s3114_s24 = sphi %s3177_s24, %s4150_s24  }
   0x4   : > { %s3202_s30 = sadd.s32 1, %s3126_s27   ;;  %s179_s8 = sadd.s32 1, %s3122_s26 }
   0x5   : > { %s176_s9 = ssub.s32 %s3126_s27, %s3202_s30  ;;  %p189_p0 = scmp.ne.s32.totalorder %s3122_s26, %s3118_s25 }
   0x6   : > { %p177_p1 = scmp.eq.s32.totalorder %s176_s9, 0  ;;  %p190_p2 = scmp.eq.s32.totalorder %s3198_s28, 1 }
   0x7   : > { %p195_p3 = scmp.ne.s32.totalorder %s3118_s25, %s3114_s24  ;;  %p196_p4 = scmp.eq.s32.totalorder %s2556_s29, 1 }
   0x8   : > { %s3213_s10 = scalar_select %p177_p1, %s3122_s26, %s179_s8  }
   0x9   : > { %p3215_p5 = por %p190_p2, %p189_p0  ;;  %p3219_p6 = por %p196_p4, %p195_p3 }
   0xa   : > { %p2559_p7 = scmp.ge.s32.totalorder %s3126_s27, 1  ;;  %p241_p8 = scmp.lt.s32.totalorder %s3126_s27, 3 }
   0xc   : > { %p242_p9 = pnand %p2559_p7, %p241_p8 }
   0xd   : > { %v2972_v0 = vld [vmem:[%s4121_s1 + $0x40] sm:$0xff] (!%p242_p9)   ;;  %v2976_v4 = vld [vmem:[%s4121_s1 + $0x48] sm:$0xff] (!%p242_p9)   ;;  %v2980_v8 = vld [vmem:[%s4121_s1 + $0x50] sm:$0xff] (!%p242_p9)   ;;  %v284_v9 = vlaneseq (!%p242_p9)  ;;  %s2561_s23 = sshll.u32 (!%p242_p9), %s3198_s28, 2  ;;  %vm398_vm0 = vcmask (!%p242_p9), 1041408   ;;  %vm4129_vm2 = vcmask (!%p242_p9), 1042432  }
   0xe   : > { %245 = sbr.rel (%p242_p9) target bundleno = 1510 (0x5e6), region = 48  ;;  %v2973_v1 = vld [vmem:[%s4121_s1] sm:$0xff] (!%p242_p9)   ;;  %2731 = vmatprep.subr.bf16.mxu0 (!%p242_p9), %v2972_v0  ;;  %v2977_v5 = vld [vmem:[%s4121_s1 + $0x8] sm:$0xff] (!%p242_p9)   ;;  %v2981_v10 = vld [vmem:[%s4121_s1 + $0x10] sm:$0xff] (!%p242_p9)   ;;  %p274_p10 = scmp.lt.s32.totalorder (!%p242_p9), %s2561_s23, 7  ;;  %vm439_vm5 = vcmask (!%p242_p9), 1040384  }
   0xf   : > { %v2974_v2 = vld [vmem:[%s4121_s1 + $0xc0] sm:$0xff] (!%p242_p9)   ;;  %2732 = vmatpush3.bf16.msra.mxu0 (!%p242_p9), %v2973_v1  ;;  %v2978_v6 = vld [vmem:[%s4121_s1 + $0xc8] sm:$0xff] (!%p242_p9)   ;;  %v2982_v11 = vld [vmem:[%s4121_s1 + $0xd0] sm:$0xff] (!%p242_p9)   ;;  %v3265_v14 = vshrl.u32 (!%p242_p9), %v284_v9, 7  ;;  %vm3128_vm6 = vmmov (!%p242_p9), 1   ;;  %vm545_vm15 = vcmask (!%p242_p9), 1045504  }
  0x10   : > { %v2975_v3 = vld [vmem:[%s4121_s1 + $0x80] sm:$0xff] (!%p242_p9)   ;;  %2759 = vmatprep.subr.bf16.mxu1 (!%p242_p9), %v2974_v2  ;;  %2733 = vmatprep.subr.bf16.mxu0 (!%p242_p9), %v2976_v4  ;;  %v2979_v7 = vld [vmem:[%s4121_s1 + $0x88] sm:$0xff] (!%p242_p9)   ;;  %v2983_v12 = vld [vmem:[%s4121_s1 + $0x90] sm:$0xff] (!%p242_p9)   ;;  %s3131_s22 = smov (!%p242_p9), 32   ;;  %s3132_s29 = smov (!%p242_p9), 64  }
  0x11   : > { %2760 = vmatpush3.bf16.msra.mxu1 (!%p242_p9), %v2975_v3  ;;  %v2984_v13 = vld [vmem:[%s4121_s1 + $0x58] sm:$0xff] (!%p242_p9)   ;;  %v2988_v18 = vld [vmem:[%s4121_s1 + $0x60] sm:$0xff] (!%p242_p9)   ;;  %v293_v19 = vand.u32 (!%p242_p9), 15, %v3265_v14  ;;  %v2992_v23 = vld [vmem:[%s4121_s1 + $0x68] sm:$0xff] (!%p242_p9)   ;;  %v287_v28 = vadd.s32 (!%p242_p9), 16, %v3265_v14  ;;  %v3339_v42 = vadd.s32 (!%p242_p9), 8, %v3265_v14 }
  0x12   : > { %2761 = vmatprep.subr.bf16.mxu1 (!%p242_p9), %v2978_v6  ;;  %v2985_v15 = vld [vmem:[%s4121_s1 + $0x18] sm:$0xff] (!%p242_p9)   ;;  %v2989_v20 = vld [vmem:[%s4121_s1 + $0x20] sm:$0xff] (!%p242_p9)   ;;  %v2993_v25 = vld [vmem:[%s4121_s1 + $0x28] sm:$0xff] (!%p242_p9)   ;;  %s270_s14 = sand.u32 (!%p242_p9), 1, %s3118_s25   ;;  %s2728_s18 = sshll.u32 (!%p242_p9), %s3198_s28, 5 }
  0x13   : > { %2734 = vmatpush3.bf16.msra.mxu0 (!%p242_p9), %v2977_v5  ;;  %v2986_v16 = vld [vmem:[%s4121_s1 + $0xd8] sm:$0xff] (!%p242_p9)   ;;  %v2990_v21 = vld [vmem:[%s4121_s1 + $0xe0] sm:$0xff] (!%p242_p9)   ;;  %v382_v24 = vadd.s32 (!%p242_p9), 4294967294, %v293_v19  ;;  %v2994_v26 = vld [vmem:[%s4121_s1 + $0xe8] sm:$0xff] (!%p242_p9)   ;;  %v337_v31 = vadd.s32 (!%p242_p9), 4294967293, %v293_v19  ;;  %v423_v33 = vadd.s32 (!%p242_p9), 4294967295, %v293_v19  ;;  %s4078_s9 = scalar_lea.hbm (!%p242_p9), %s4127_s7, %s2728_s18 }
  0x14   : > { %2735 = vmatprep.subr.bf16.mxu0 (!%p242_p9), %v2980_v8  ;;  %v2987_v17 = vld [vmem:[%s4121_s1 + $0x98] sm:$0xff] (!%p242_p9)   ;;  %v2991_v22 = vld [vmem:[%s4121_s1 + $0xa0] sm:$0xff] (!%p242_p9)   ;;  %v2995_v27 = vld [vmem:[%s4121_s1 + $0xa8] sm:$0xff] (!%p242_p9)   ;;  %v3317_v35 = vand.u32 (!%p242_p9), 15, %v287_v28  ;;  %v3397_v6 = vand.u32 (!%p242_p9), 15, %v3339_v42  ;;  %s2560_s15 = sshll.u32 (!%p242_p9), %s270_s14, 1 }
  0x15   : > { %2762 = vmatpush3.bf16.msra.mxu1 %v2979_v7  ;;  %s4155_s23 = smov (!%p274_p10, %s2561_s23), 7  ;;  %v2996_v29 = vld [vmem:[%s4121_s1 + $0x70] sm:$0xff]   ;;  %vm386_vm1 = vcmp.ge.s32.totalorder %v382_v24, 0  ;;  %v3000_v36 = vld [vmem:[%s4121_s1 + $0x78] sm:$0xff]   ;;  %vm341_vm3 = vcmp.ge.s32.totalorder %v337_v31, 0  ;;  %vm427_vm4 = vcmp.ge.s32.totalorder %v423_v33, 0 }
  0x16   : > { %2763 = vmatprep.subr.bf16.mxu1 %v2982_v11  ;;  %s2562_s19 = sshll.u32 %s4155_s23, 3  ;;  %v2997_v30 = vld [vmem:[%s4121_s1 + $0x30] sm:$0xff]   ;;  %v3001_v37 = vld [vmem:[%s4121_s1 + $0x38] sm:$0xff]   ;;  %v3336_v41 = vadd.s32 4294967294, %v3317_v35  ;;  %vm3345_vm7 = vmpackc.low %vm3128_vm6, %vm386_vm1  ;;  %v3351_v47 = vadd.s32 4294967293, %v3317_v35  ;;  %v3436_v24 = vadd.s32 2, %v3397_v6 }
  0x17   : > { %2736 = vmatpush3.bf16.msra.mxu0 %v2981_v10  ;;  %v2998_v32 = vld [vmem:[%s4121_s1 + $0xf0] sm:$0xff]   ;;  %s277_s21 = scalar_lea.vmem %s4120_s0, %s2562_s19  ;;  %v3002_v38 = vld [vmem:[%s4121_s1 + $0xf8] sm:$0xff]   ;;  %vm3361_vm8 = vmpackc.low %vm3128_vm6, %vm341_vm3  ;;  %s3133_s19 = smov 96  }
  0x18   : > { %2737 = vmatprep.subr.bf16.mxu0 %v2984_v13  ;;  %v2999_v34 = vld [vmem:[%s4121_s1 + $0xb0] sm:$0xff]   ;;  %v3331_v39 = vld [vmem:[%s277_s21] sm:$0xff]  ;;  %v3333_v40 = vld [vmem:[%s277_s21 + $0x8] sm:$0xff]  ;;  %vm388_vm10 = vcmp.ge.s32.totalorder %v3336_v41, 0  ;;  %vm343_vm11 = vcmp.ge.s32.totalorder %v3351_v47, 0  ;;  %vm538_vm14 = vcmp.lt.s32.totalorder %v3436_v24, 16 }
  0x19   : > { %2764 = vmatpush3.bf16.msra.mxu1 %v2983_v12  ;;  %v399_v43 = vrot.slane %v3331_v39, 6  ;;  %v400_v44 = vrot.slane %v3333_v40, 6  ;;  %v358_v46 = vrot.slane %v3331_v39, 5  ;;  %v3353_v48 = vld [vmem:[%s277_s21 + $0x10] sm:$0xff]  ;;  %v3003_v49 = vld [vmem:[%s4121_s1 + $0xb8] sm:$0xff]   ;;  %v359_v50 = vrot.slane %v3333_v40, 5  ;;  %vm3376_vm9 = vmpackc.low %vm3128_vm6, %vm427_vm4 }
  0x1a   : > { %2765 = vmatprep.subr.bf16.mxu1 %v2986_v16  ;;  %v726_v52 = vpack.c.bf16 %v3333_v40, %v3331_v39  ;;  %v440_v53 = vrot.slane %v3331_v39, 7  ;;  %v441_v54 = vrot.slane %v3333_v40, 7  ;;  %v3369_v55 = vld [vmem:[%s277_s21 + $0x18] sm:$0xff]  ;;  %v3004_v62 = vld [vmem:[%s4121_s1 + $0x140] sm:$0xff]   ;;  %v3007_v7 = vld [vmem:[%s4121_s1 + $0x148] sm:$0xff]   ;;  %v402_v8 = vrot.slane %v3353_v48, 6 }
  0x1b   : > { %2738 = vmatpush3.bf16.msra.mxu0 %v2985_v15  ;;  %v401_v56 = vsel %vm398_vm0, %v399_v43, %v400_v44  ;;  %v410_v57 = vsel %vm398_vm0, 0.0, %v399_v43  ;;  %v369_v58 = vsel %vm4129_vm2, 0.0, %v358_v46  ;;  %v360_v61 = vsel %vm4129_vm2, %v358_v46, %v359_v50  ;;  %v3005_v2 = vld [vmem:[%s4121_s1 + $0x100] sm:$0xff]   ;;  %v3008_v9 = vld [vmem:[%s4121_s1 + $0x108] sm:$0xff]   ;;  %v3010_v13 = vld [vmem:[%s4121_s1 + $0x150] sm:$0xff]   ;;  %s272_s20 = scalar_lea.vmem [#allocation2], %s2560_s15 }
  0x1c   : > { %2739 = vmatprep.subr.bf16.mxu0 %v2988_v18  ;;  %v2621_v60 = vpack.c.bf16 %v401_v56, %v410_v57  ;;  %1159 = vmatprep.mubr.bf16.mxu1 %v726_v52  ;;  %v442_v63 = vsel %vm439_vm5, %v440_v53, %v441_v54  ;;  %v451_v0 = vsel %vm439_vm5, 0.0, %v440_v53  ;;  %v2624_v1 = vpack.c.bf16 %v360_v61, %v369_v58  ;;  %v3006_v4 = vld [vmem:[%s4121_s1 + $0x180] sm:$0xff]   ;;  %v3009_v11 = vld [vmem:[%s4121_s1 + $0x188] sm:$0xff]   ;;  %v3011_v16 = vld [vmem:[%s4121_s1 + $0x110] sm:$0xff]   ;;  %s2497_s21 = sshll.u32 %s272_s20, 4  ;;  %s3136_s23 = smov [#allocation2]   ;;  %s4080_s21 = int_to_ptr.vmem [resolvable:$true] %s2497_s21 }
  0x1d   : > { %2766 = vmatpush3.bf16.msra.mxu1 %v2987_v17  ;;  %v2633_v3 = vpack.c.bf16 %v442_v63, %v451_v0  ;;  %v733_v5 = vpack.c.bf16 %v3369_v55, %v3353_v48  ;;  %v404_v10 = vrot.slane %v3369_v55, 6  ;;  %v361_v12 = vrot.slane %v3353_v48, 5  ;;  %v3012_v18 = vld [vmem:[%s4121_s1 + $0x190] sm:$0xff]   ;;  %v3014_v31 = vld [vmem:[%s4121_s1 + $0x118] sm:$0xff]   ;;  %vm2626_vm12 = vmpackc.low %vm3128_vm6, %vm388_vm10  ;;  %s3064_s28 = scalar_lea.vmem %s4080_s21, 32 }
  0x1e   : > { %2767 = vmatprep.subr.bf16.mxu1 %v2990_v21  ;;  %2622 = vmatprep.mubr.msk.bf16.mxu0 %vm3345_vm7, %v2621_v60  ;;  %v363_v15 = vrot.slane %v3369_v55, 5  ;;  %v443_v17 = vrot.slane %v3353_v48, 7  ;;  %v403_v19 = vsel %vm398_vm0, %v400_v44, %v402_v8  ;;  %v445_v21 = vrot.slane %v3369_v55, 7  ;;  %v3017_v43 = vld [vmem:[%s4121_s1 + $0x120] sm:$0xff]   ;;  %vm3470_vm1 = vmpackc.low %vm3128_vm6, %vm343_vm11  ;;  %v3020_v60 = vld [vmem:[%s4121_s1 + $0x128] sm:$0xff]   ;;  %p3065_p11 = scmp.ne.s32.totalorder %s4080_s21, %s3064_s28 }
  0x1f   : > { %2740 = vmatpush3.bf16.msra.mxu0 %v2989_v20  ;;  %v405_v20 = vsel %vm398_vm0, %v402_v8, %v404_v10  ;;  %v362_v28 = vsel %vm4129_vm2, %v359_v50, %v361_v12  ;;  %v587_v45 = vrot.slane %v3331_v39, 3  ;;  %v588_v46 = vrot.slane %v3333_v40, 3  ;;  %v3019_v50 = vld [vmem:[%s4121_s1 + $0x168] sm:$0xff]   ;;  %v3023_v63 = vld [vmem:[%s4121_s1 + $0x130] sm:$0xff]   ;;  %v3026_v10 = vld [vmem:[%s4121_s1 + $0x138] sm:$0xff]  }
  0x20   : > { %2741 = vmatprep.subr.bf16.mxu0 %v2992_v23  ;;  %v425_v23 = vadd.s32 4294967295, %v3317_v35  ;;  %v446_v33 = vsel %vm439_vm5, %v443_v17, %v445_v21  ;;  %v3016_v35 = vld [vmem:[%s4121_s1 + $0x160] sm:$0xff]   ;;  %vm4130_vm4 = vcmask 1044480   ;;  %v505_v52 = vrot.slane %v3331_v39, 1  ;;  %v3024_v0 = vld [vmem:[%s4121_s1 + $0x1b0] sm:$0xff]   ;;  %p3066_p12 = pnand %p3065_p11, %p3215_p5 }
  0x21   : > { %2768 = vmatpush3.bf16.msra.mxu1 %v2991_v22  ;;  %v3013_v22 = vld [vmem:[%s4121_s1 + $0x158] sm:$0xff]   ;;  %v571_v53 = vadd.s32 3, %v3397_v6  ;;  %v288_v56 = vadd.s32 24, %v3265_v14  ;;  %v506_v57 = vrot.slane %v3333_v40, 1  ;;  %v508_v58 = vrot.slane %v3353_v48, 1 }
  0x22   : > { %2769 = vmatprep.subr.bf16.mxu1 %v2994_v26  ;;  %v3015_v26 = vld [vmem:[%s4121_s1 + $0x198] sm:$0xff]   ;;  %vm429_vm13 = vcmp.ge.s32.totalorder %v425_v23, 0  ;;  %v589_v59 = vsel %vm4130_vm4, %v587_v45, %v588_v46  ;;  %vm4128_vm11 = vcmask 1046528   ;;  %p3067_p13 = pneg %p3066_p12 }
  0x23   : > { %2742 = vmatpush3.bf16.msra.mxu0 %v2993_v25  ;;  %v3439_v25 = vadd.s32 1, %v3397_v6  ;;  %vm2635_vm7 = vmpackc.low %vm3128_vm6, %vm429_vm13  ;;  %v551_v6 = vrot.slane %v3369_v55, 2 }
  0x24   : > { %2743 = vmatprep.subr.bf16.mxu0 %v2996_v29  ;;  %v364_v29 = vsel %vm4129_vm2, %v361_v12, %v363_v15  ;;  %v507_v15 = vsel %vm4128_vm11, %v505_v52, %v506_v57 }
  0x25   : > { %2770 = vmatpush3.bf16.msra.mxu1 %v2995_v27  ;;  %v2627_v27 = vpack.c.bf16 %v405_v20, %v403_v19  ;;  %vm497_vm3 = vcmp.lt.s32.totalorder %v3439_v25, 16  ;;  %v3028_v25 = vld [vmem:[%s4122_s2] sm:$0xff]  }
  0x26   : > { %2771 = vmatprep.subr.bf16.mxu1 %v2998_v32  ;;  %v444_v32 = vsel %vm439_vm5, %v441_v54, %v443_v17  ;;  %v3021_v54 = vld [vmem:[%s4121_s1 + $0x1a8] sm:$0xff]  }
  0x27   : > { %2744 = vmatpush3.bf16.msra.mxu0 %v2997_v30  ;;  %v546_v30 = vrot.slane %v3331_v39, 2  ;;  %v2636_v41 = vpack.c.bf16 %v446_v33, %v444_v32  ;;  %v3034_v32 = vld [vmem:[%s4122_s2 + $0x30] sm:$0xff]   ;;  %v3035_v33 = vld [vmem:[%s4122_s2 + $0x38] sm:$0xff]  }
  0x28   : > { %2745 = vmatprep.subr.bf16.mxu0 %v3000_v36  ;;  %v549_v36 = vrot.slane %v3353_v48, 2 }
  0x29   : > { %2772 = vmatpush3.bf16.msra.mxu1 %v2999_v34  ;;  %v547_v34 = vrot.slane %v3333_v40, 2  ;;  %v3022_v40 = vld [vmem:[%s4121_s1 + $0x170] sm:$0xff]  }
  0x2a   : > { %2773 = vmatprep.subr.bf16.mxu1 %v3002_v38  ;;  %v2630_v38 = vpack.c.bf16 %v364_v29, %v362_v28  ;;  %v552_v20 = vsel %vm545_vm15, %v549_v36, %v551_v6  ;;  %v3030_v28 = vld [vmem:[%s4122_s2 + $0x10] sm:$0xff]   ;;  %v3031_v29 = vld [vmem:[%s4122_s2 + $0x18] sm:$0xff]  }
  0x2b   : > { %2746 = vmatpush3.bf16.msra.mxu0 %v3001_v37  ;;  %v3018_v37 = vld [vmem:[%s4121_s1 + $0x1a0] sm:$0xff]   ;;  %v548_v47 = vsel %vm545_vm15, %v546_v30, %v547_v34  ;;  %v550_v51 = vsel %vm545_vm15, %v547_v34, %v549_v36 }
  0x2c   : > { %2787 = vmatprep.subr.bf16.mxu0 %v3004_v62  ;;  %v2639_v61 = vpack.c.bf16 %v550_v51, %v548_v47  ;;  %v314_v62 = vand.u32 15, %v288_v56  ;;  %v3032_v30 = vld [vmem:[%s4122_s2 + $0x20] sm:$0xff]  }
  0x2d   : > { %2774 = vmatpush3.bf16.msra.mxu1 %v3003_v49  ;;  %v590_v49 = vrot.slane %v3353_v48, 3  ;;  %v3036_v34 = vld [vmem:[%s4122_s2 + $0x40] sm:$0xff]  }
  0x2e   : > { %2625 = vmatmul.mubr.msk.bf16.vlgmr.msra.gmra.mrb[0].mxu0 %vm3361_vm8, %v2624_v1  ;;  %2855 = vmatprep.subr.bf16.mxu1 %v3006_v4  ;;  %vm579_vm8 = vcmp.lt.s32.totalorder %v571_v53, 16  ;;  %v491_v8 = vadd.s32 1, %v314_v62 }
  0x2f   : > { %2788 = vmatpush3.bf16.msra.mxu0 %v3005_v2  ;;  %2628 = vmatprep.mubr.msk.bf16.mxu0 %vm2626_vm12, %v2627_v27  ;;  %v591_v39 = vsel %vm4130_vm4, %v588_v46, %v590_v49  ;;  %v573_v2 = vadd.s32 3, %v314_v62  ;;  %vm2650_vm12 = vmpackc.low %vm579_vm8, %vm3128_vm6  ;;  %v3029_v27 = vld [vmem:[%s4122_s2 + $0x8] sm:$0xff]  }
  0x30   : > { %2634 = vmatmul.mubr.msk.bf16.vlgmr.msra.gmra.mrb[0].mxu1 %vm3376_vm9, %v2633_v3  ;;  %2789 = vmatprep.subr.bf16.mxu0 %v3007_v7  ;;  %v2651_v1 = vpack.c.bf16 %v591_v39, %v589_v59  ;;  %v3025_v3 = vld [vmem:[%s4121_s1 + $0x178] sm:$0xff]   ;;  %vm2638_vm9 = vmpackc.low %vm538_vm14, %vm3128_vm6 }
  0x31   : > { %2856 = vmatpush3.bf16.msra.mxu1 %v3006_v4  ;;  %1167 = vmatprep.mubr.bf16.mxu1 %v733_v5  ;;  %v592_v4 = vrot.slane %v3369_v55, 3  ;;  %v532_v5 = vadd.s32 2, %v314_v62  ;;  %v3027_v7 = vld [vmem:[%s4121_s1 + $0x1b8] sm:$0xff]   ;;  %vm581_vm10 = vcmp.lt.s32.totalorder %v573_v2, 16  ;;  %vm3533_vm14 = vmpackc.low %vm497_vm3, %vm3128_vm6 }
  0x32   : > { %2857 = vmatprep.subr.bf16.mxu1 %v3009_v11 }
  0x33   : > { %2790 = vmatpush3.bf16.msra.mxu0 %v3008_v9  ;;  %v510_v9 = vrot.slane %v3369_v55, 1  ;;  %vm540_vm13 = vcmp.lt.s32.totalorder %v532_v5, 16  ;;  %v598_v55 = vsel %vm4130_vm4, %v592_v4, 0.0  ;;  %v593_v19 = vsel %vm4130_vm4, %v590_v49, %v592_v4  ;;  %v3037_v49 = vld [vmem:[%s4122_s2 + $0x48] sm:$0xff]  }
  0x34   : > { %2791 = vmatprep.subr.bf16.mxu0 %v3010_v13  ;;  %v557_v13 = vsel %vm545_vm15, %v551_v6, 0.0  ;;  %vm3547_vm3 = vmpackc.low %vm540_vm13, %vm3128_vm6  ;;  %vm1564_vm13 = vcmask 1046534  }
  0x35   : > { %2858 = vmatpush3.bf16.msra.mxu1 %v3009_v11  ;;  %v2645_v23 = vpack.c.bf16 %v557_v13, %v552_v20  ;;  %v511_v48 = vsel %vm4128_vm11, %v508_v58, %v510_v9 }
  0x36   : > { %2859 = vmatprep.subr.bf16.mxu1 %v3012_v18  ;;  %2631 = vmatmul.mubr.msk.bf16.gmra.mrb[4].mxu0 %vm3470_vm1, %v2630_v38  ;;  %vm3539_vm1 = vmpackc.low %vm581_vm10, %vm3128_vm6  ;;  %vm1570_vm10 = vcmask 1042434  }
  0x37   : > { %2792 = vmatpush3.bf16.msra.mxu0 %v3011_v16  ;;  %2640 = vmatprep.mubr.msk.bf16.mxu0 %vm2638_vm9, %v2639_v61  ;;  %v509_v16 = vsel %vm4128_vm11, %v506_v57, %v508_v58  ;;  %v3038_v57 = vld [vmem:[%s4122_s2 + $0x50] sm:$0xff]   ;;  %vm1560_vm9 = vcmask 1044484  }
  0x38   : > { %2793 = vmatprep.subr.bf16.mxu0 %v3013_v22  ;;  %2637 = vmatmul.mubr.msk.bf16.gmra.mrb[4].mxu1 %vm2635_vm7, %v2636_v41  ;;  %vm499_vm7 = vcmp.lt.s32.totalorder %v491_v8, 16  ;;  %v2642_v21 = vpack.c.bf16 %v509_v16, %v507_v15  ;;  %v2654_v22 = vpack.c.bf16 %v598_v55, %v593_v19 }
  0x39   : > { %2860 = vmatpush3.bf16.msra.mxu1 %v3012_v18  ;;  %2871 = vmatprep.mubr.msk.bf16.mxu1 %vm2650_vm12, %v2651_v1  ;;  %v516_v18 = vsel %vm4128_vm11, %v510_v9, 0.0  ;;  %vm2647_vm8 = vmpackc.low %vm499_vm7, %vm3128_vm6  ;;  %vm1572_vm6 = vcmask 1043459   ;;  %vm1562_vm12 = vcmask 1045509  }
  0x3a   : > { %2861 = vmatprep.subr.bf16.mxu1 %v3015_v26  ;;  %v2648_v24 = vpack.c.bf16 %v516_v18, %v511_v48 }
  0x3b   : > { %2794 = vmatpush3.bf16.msra.mxu0 %v3014_v31  ;;  %v3033_v31 = vld [vmem:[%s4122_s2 + $0x28] sm:$0xff]  }
  0x3c   : > { %2795 = vmatprep.subr.bf16.mxu0 %v3016_v35 }
  0x3d   : > { %2862 = vmatpush3.bf16.msra.mxu1 %v3015_v26  ;;  %v3129_v26 = vmov 0  }
  0x3e   : > { %2863 = vmatprep.subr.bf16.mxu1 %v3018_v37 }
  0x3f   : > { %2796 = vmatpush3.bf16.msra.mxu0 %v3017_v43 }
  0x40   : > { %2797 = vmatprep.subr.bf16.mxu0 %v3019_v50 }
  0x41   : > { %2864 = vmatpush3.bf16.msra.mxu1 %v3018_v37  ;;  %v2563_v37 = vld [vmem:[%s4126_s6] ss:$0 sm:$0xff] }
  0x42   : > { %2865 = vmatprep.subr.bf16.mxu1 %v3021_v54 }
  0x43   : > { %2798 = vmatpush3.bf16.msra.mxu0 %v3020_v60 }
  0x44   : > { %2799 = vmatprep.subr.bf16.mxu0 %v3022_v40 }
  0x45   : > { %2866 = vmatpush3.bf16.msra.mxu1 %v3021_v54 }
  0x46   : > { %2867 = vmatprep.subr.bf16.mxu1 %v3024_v0 }
  0x47   : > { %2800 = vmatpush3.bf16.msra.mxu0 %v3023_v63 }
  0x48   : > { %2801 = vmatprep.subr.bf16.mxu0 %v3025_v3 }
  0x49   : > { %2868 = vmatpush3.bf16.msra.mxu1 %v3024_v0 }
  0x4a   : > { %2869 = vmatprep.subr.bf16.mxu1 %v3027_v7 }
  0x4b   : > { %2802 = vmatpush3.bf16.msra.mxu0 %v3026_v10  ;;  %v3130_v10 = vmov 1983009808  }
  0x4c   : > { %1951 = vmatprep.subr.bf16.mxu0 %v3129_v26  ;;  %v1301_v11 = vunpack.c.l.s4 %v3130_v10 }
  0x4d   : > { %2870 = vmatpush3.bf16.msra.mxu1 %v3027_v7 }
  0x4e   : > { %2643 = vmatmul.mubr.msk.bf16.vlgmr.msra.gmra.mrb[8].mxu0 %vm3533_vm14, %v2642_v21  ;;  %vm1568_vm14 = vcmask 1041409  }
  0x4f   : > { %2646 = vmatprep.mubr.msk.bf16.mxu0 %vm3547_vm3, %v2645_v23  ;;  %1952 = vmatpush1.bf16.msra.mxu0 %v3028_v25  ;;  %v1467_v23 = vand.u32 7, %v3265_v14  ;;  %v3616_v25 = vand.u32 7, %v3339_v42 }
  0x50   : > { %2872 = vmatmul.mubr.msk.bf16.vlgmr.msra.gmra.mrb[8].mxu1 %vm3539_vm1, %v2654_v22  ;;  %1953 = vmatprep.subr.bf16.mxu0 %v3129_v26  ;;  %v1302_v22 = vunpack.c.0.s8 %v1301_v11  ;;  %vm1566_vm1 = vcmask 1047559  }
  0x53   : > { %1954 = vmatpush1.bf16.msra.mxu0 %v3029_v27  ;;  %v3621_v27 = vld [vmem:[%s4126_s6 + $0x5] ss:$0 sm:$0xff] }
  0x54   : > { %1955 = vmatprep.subr.bf16.mxu0 %v3129_v26 }
  0x56   : > { %2649 = vmatmul.mubr.msk.bf16.gmra.mrb[12].mxu0 %vm2647_vm8, %v2648_v24 }
  0x57   : > { %1956 = vmatpush1.bf16.msra.mxu0 %v3030_v28 }
  0x58   : > { %1957 = vmatprep.subr.bf16.mxu0 %v3129_v26 }
  0x5b   : > { %1958 = vmatpush1.bf16.msra.mxu0 %v3031_v29 }
  0x5c   : > { %1959 = vmatprep.subr.bf16.mxu0 %v3129_v26 }
  0x5f   : > { %1960 = vmatpush1.bf16.msra.mxu0 %v3032_v30 }
  0x60   : > { %1961 = vmatprep.subr.bf16.mxu0 %v3129_v26 }
  0x63   : > { %1962 = vmatpush1.bf16.msra.mxu0 %v3033_v31  ;;  %v3624_v31 = vsub.s32 %v1302_v22, %v3265_v14 }
  0x64   : > { %1963 = vmatprep.subr.bf16.mxu0 %v3129_v26 }
  0x67   : > { %1964 = vmatpush1.bf16.msra.mxu0 %v3034_v32  ;;  %v3627_v32 = vsub.s32 0, %v3265_v14 }
  0x68   : > { %1965 = vmatprep.subr.bf16.mxu0 %v3129_v26 }
  0x6b   : > { %1966 = vmatpush1.bf16.msra.mxu0 %v3035_v33 }
  0x6c   : > { %1967 = vmatprep.subr.bf16.mxu0 %v3129_v26 }
  0x6f   : > { %1968 = vmatpush1.bf16.msra.mxu0 %v3036_v34  ;;  %v3629_v34 = vadd.s32 4294967294, %v1467_v23 }
  0x70   : > { %1969 = vmatprep.subr.bf16.mxu0 %v3129_v26 }
  0x71   : > { %vm1589_vm3 = vcmp.ge.s32.totalorder %v3629_v34, 0 }
  0x73   : > { %1970 = vmatpush1.bf16.msra.mxu0 %v3037_v49 }
  0x74   : > { %1971 = vmatprep.subr.bf16.mxu0 %v3129_v26 }
  0x77   : > { %1972 = vmatpush1.bf16.msra.mxu0 %v3038_v57 }
  0x78   : > { %1973 = vmatprep.subr.bf16.mxu0 %v3129_v26 }
 0x101   : > { %v2747_v35 = vpop.f32.mrb[0].mxu0 }
 0x102   : > { %v2748_v38 = vpop.f32.mrb[1].mxu0 }
 0x103   : > { %v2775_v36 = vpop.f32.mrb[0].mxu1  ;;  %v2749_v44 = vadd.f32 %v2748_v38, %v2747_v35  ;;  %v2750_v41 = vpop.f32.mrb[2].mxu0 }
 0x104   : > { %v2776_v43 = vpop.f32.mrb[1].mxu1  ;;  %v2751_v50 = vpop.f32.mrb[3].mxu0 }
 0x105   : > { %v2777_v45 = vadd.f32 %v2776_v43, %v2775_v36  ;;  %v2778_v46 = vpop.f32.mrb[2].mxu1  ;;  %v1113_v51 = vadd.f32 %v2749_v44, %v2563_v37  ;;  %v2752_v52 = vadd.f32 %v2751_v50, %v2750_v41  ;;  %v3633_v41 = vadd.s32 4294967294, %v3616_v25 }
 0x106   : > { %v2779_v47 = vpop.f32.mrb[3].mxu1 }
 0x107   : > { %v2780_v53 = vadd.f32 %v2779_v47, %v2778_v46  ;;  %v1116_v54 = vadd.f32 %v2752_v52, %v2563_v37  ;;  %v1162_v56 = vadd.f32 %v2777_v45, %v1113_v51  ;;  %v3635_v45 = vadd.s32 4294967295, %v1467_v23 }
 0x108   : > { %v3637_v46 = vadd.s32 2, %v1467_v23  ;;  %v3641_v51 = vadd.s32 4294967295, %v3616_v25  ;;  %v3644_v52 = vadd.s32 2, %v3616_v25  ;;  %vm1590_vm8 = vcmp.ge.s32.totalorder %v3633_v41, 0 }
 0x109   : > { %v1165_v58 = vadd.f32 %v2780_v53, %v1116_v54  ;;  %v2753_v59 = vpop.f32.mrb[4].mxu0  ;;  %v3646_v53 = vadd.s32 3, %v1467_v23  ;;  %v3649_v54 = vadd.s32 3, %v3616_v25  ;;  %vm1623_vm7 = vcmp.ge.s32.totalorder %v3635_v45, 0 }
 0x10a   : > { %v2754_v39 = vpop.f32.mrb[5].mxu0  ;;  %vm1624_vm11 = vcmp.ge.s32.totalorder %v3641_v51, 0  ;;  %vm1723_vm2 = vcmp.lt.s32.totalorder %v3637_v46, 8 }
 0x10b   : > { %v2781_v60 = vpop.f32.mrb[4].mxu1  ;;  %v2755_v61 = vadd.f32 %v2754_v39, %v2753_v59  ;;  %v2756_v62 = vpop.f32.mrb[6].mxu0  ;;  %vm1753_vm4 = vcmp.lt.s32.totalorder %v3649_v54, 8 }
 0x10c   : > { %v2782_v40 = vpop.f32.mrb[5].mxu1  ;;  %v2757_v63 = vpop.f32.mrb[7].mxu0 }
 0x10d   : > { %v2783_v0 = vadd.f32 %v2782_v40, %v2781_v60  ;;  %v2784_v1 = vpop.f32.mrb[6].mxu1  ;;  %v1121_v2 = vadd.f32 %v2755_v61, %v2563_v37  ;;  %v2758_v3 = vadd.f32 %v2757_v63, %v2756_v62  ;;  %v3652_v60 = vadd.s32 4294967293, %v1467_v23 }
 0x10e   : > { %v2785_v4 = vpop.f32.mrb[7].mxu1  ;;  %v3655_v61 = vadd.s32 4294967293, %v3616_v25  ;;  %v3657_v62 = vadd.s32 1, %v1467_v23 }
 0x10f   : > { %v2786_v5 = vadd.f32 %v2785_v4, %v2784_v1  ;;  %v1124_v6 = vadd.f32 %v2758_v3, %v2563_v37  ;;  %v1170_v7 = vadd.f32 %v2783_v0, %v1121_v2 }
 0x111   : > { %v1173_v8 = vadd.f32 %v2786_v5, %v1124_v6 }
 0x121   : > { %v2803_v9 = vpop.f32.mrb[8].mxu0 }
 0x122   : > { %v2804_v55 = vpop.f32.mrb[9].mxu0 }
 0x123   : > { %v2873_v12 = vpop.f32.mrb[8].mxu1  ;;  %v2805_v13 = vadd.f32 %v2804_v55, %v2803_v9  ;;  %v2806_v15 = vpop.f32.mrb[10].mxu0 }
 0x124   : > { %v1259_v16 = vpop.f32.mrb[9].mxu1  ;;  %v2807_v17 = vpop.f32.mrb[11].mxu0 }
 0x125   : > { %v2874_v18 = vpop.f32.mrb[10].mxu1  ;;  %v2808_v19 = vadd.f32 %v2807_v17, %v2806_v15  ;;  %v1211_v20 = vadd.f32 %v2805_v13, %v1162_v56 }
 0x126   : > { %v1262_v21 = vpop.f32.mrb[11].mxu1 }
 0x127   : > { %v1260_v48 = vadd.f32 %v1259_v16, %v1211_v20  ;;  %v1214_v24 = vadd.f32 %v2808_v19, %v1165_v58 }
 0x129   : > { %v1279_v28 = vmin.f32 %v1260_v48, 0.0  ;;  %v1263_v29 = vadd.f32 %v1262_v21, %v1214_v24  ;;  %v2809_v30 = vpop.f32.mrb[12].mxu0  ;;  %v1275_v35 = vmax.f32 %v1260_v48, 0.0 }
 0x12a   : > { %v2810_v33 = vpop.f32.mrb[13].mxu0 }
 0x12b   : > { %v1287_v42 = vmul.f32 %v3621_v27, %v1279_v28  ;;  %v1280_v36 = vmin.f32 %v1263_v29, 0.0  ;;  %v2811_v37 = vadd.f32 %v2810_v33, %v2809_v30  ;;  %v2812_v38 = vpop.f32.mrb[14].mxu0  ;;  %v1276_v43 = vmax.f32 %v1263_v29, 0.0 }
 0x12c   : > { %v2813_v44 = vpop.f32.mrb[15].mxu0 }
 0x12d   : > { %v1291_v14 = vadd.f32 %v1287_v42, %v1275_v35  ;;  %v1288_v49 = vmul.f32 %v3621_v27, %v1280_v36  ;;  %v1219_v50 = vadd.f32 %v2811_v37, %v1170_v7  ;;  %v2814_v47 = vadd.f32 %v2813_v44, %v2812_v38 }
 0x12f   : > { %v1299_v56 = vcombine.high %v1291_v14, %v1291_v14  ;;  %v1306_v57 = vrot.slane %v1291_v14, %v3624_v31  ;;  %v1292_v58 = vadd.f32 %v1288_v49, %v1276_v43  ;;  %v1268_v59 = vadd.f32 %v2873_v12, %v1219_v50 }
 0x130   : > { %v1222_v39 = vadd.f32 %v2814_v47, %v1173_v8 }
 0x131   : > { %v1313_v40 = vrot.slane %v1299_v56, %v3624_v31  ;;  %v1314_v63 = vcombine.high %v1306_v57, %v1306_v57  ;;  %v2657_v0 = vrot.slane %v1306_v57, 9  ;;  %v1316_v1 = vcombine.high %v1292_v58, %v1292_v58 }
 0x132   : > { %v1323_v2 = vrot.slane %v1292_v58, %v3624_v31  ;;  %v1277_v3 = vmax.f32 %v1268_v59, 0.0  ;;  %v1281_v4 = vmin.f32 %v1268_v59, 0.0  ;;  %v1271_v5 = vadd.f32 %v2874_v18, %v1222_v39 }
 0x133   : > { %v1315_v6 = vcombine.high %v1313_v40, %v1313_v40  ;;  %v2658_v7 = vrot.slane %v1314_v63, 9  ;;  %v2659_v8 = vrot.slane %v1313_v40, 9  ;;  %v1431_v9 = vadd.f32 %v2657_v0, %v1306_v57 }
 0x134   : > { %v1330_v10 = vrot.slane %v1316_v1, %v3624_v31  ;;  %v1331_v11 = vcombine.high %v1323_v2, %v1323_v2  ;;  %v2661_v55 = vrot.slane %v1323_v2, 9  ;;  %v1289_v12 = vmul.f32 %v3621_v27, %v1281_v4 }
 0x135   : > { %v2660_v13 = vrot.slane %v1315_v6, 9  ;;  %v1432_v15 = vadd.f32 %v2658_v7, %v1314_v63  ;;  %v1433_v16 = vadd.f32 %v2659_v8, %v1313_v40  ;;  %v1447_v17 = vmul.f32 0.5, %v1431_v9 }
 0x136   : > { %v1332_v19 = vcombine.high %v1330_v10, %v1330_v10  ;;  %v2662_v18 = vrot.slane %v1331_v11, 9  ;;  %v2663_v20 = vrot.slane %v1330_v10, 9  ;;  %v1435_v21 = vadd.f32 %v2661_v55, %v1323_v2 }
 0x137   : > { %v1434_v22 = vadd.f32 %v2660_v13, %v1315_v6  ;;  %v1448_v23 = vmul.f32 0.5, %v1432_v15  ;;  %v1449_v48 = vmul.f32 0.5, %v1433_v16  ;;  %v3664_v24 = vrot.slane %v1447_v17, %v3627_v32 }
 0x138   : > { %v2664_v28 = vrot.slane %v1332_v19, 9  ;;  %v1436_v29 = vadd.f32 %v2662_v18, %v1331_v11  ;;  %v1437_v30 = vadd.f32 %v2663_v20, %v1330_v10  ;;  %v1451_v33 = vmul.f32 0.5, %v1435_v21 }
 0x139   : > { %v1450_v35 = vmul.f32 0.5, %v1434_v22  ;;  %v3667_v42 = vrot.slane %v1448_v23, %v3627_v32  ;;  %v3670_v36 = vrot.slane %v1449_v48, %v3627_v32  ;;  %v1293_v37 = vadd.f32 %v1289_v12, %v1277_v3 }
 0x13a   : > { %v1438_v38 = vadd.f32 %v2664_v28, %v1332_v19  ;;  %v1452_v43 = vmul.f32 0.5, %v1436_v29  ;;  %v1453_v44 = vmul.f32 0.5, %v1437_v30  ;;  %v3673_v14 = vrot.slane %v1451_v33, %v3627_v32 }
 0x13b   : > { %v3676_v49 = vrot.slane %v1450_v35, %v3627_v32  ;;  %v1333_v50 = vcombine.high %v1293_v37, %v1293_v37  ;;  %v1340_v47 = vrot.slane %v1293_v37, %v3624_v31  ;;  %v1278_v56 = vmax.f32 %v1271_v5, 0.0 }
 0x13c   : > { %v1454_v57 = vmul.f32 0.5, %v1438_v38  ;;  %v3680_v58 = vrot.slane %v1452_v43, %v3627_v32  ;;  %v3683_v59 = vrot.slane %v1453_v44, %v3627_v32  ;;  %v1282_v39 = vmin.f32 %v1271_v5, 0.0 }
 0x13d   : > { %v1347_v40 = vrot.slane %v1333_v50, %v3624_v31  ;;  %v1348_v63 = vcombine.high %v1340_v47, %v1340_v47  ;;  %v2665_v0 = vrot.slane %v1340_v47, 9  ;;  %v1600_v1 = vsel %vm1572_vm6, %v3667_v42, %v3664_v24 }
 0x13e   : > { %v3690_v2 = vrot.slane %v1454_v57, %v3627_v32  ;;  %v1290_v3 = vmul.f32 %v3621_v27, %v1282_v39  ;;  %v1601_v4 = vsel %vm1560_vm9, %v3670_v36, %v1600_v1  ;;  %v1634_v5 = vsel %vm1570_vm10, %v3667_v42, %v3664_v24 }
 0x13f   : > { %v1349_v6 = vcombine.high %v1347_v40, %v1347_v40  ;;  %v2666_v7 = vrot.slane %v1348_v63, 9  ;;  %v2667_v8 = vrot.slane %v1347_v40, 9  ;;  %v1439_v9 = vadd.f32 %v2665_v0, %v1340_v47 }
 0x140   : > { %v1294_v10 = vadd.f32 %v1290_v3, %v1278_v56  ;;  %v1602_v11 = vsel %vm1562_vm12, %v3676_v49, %v1601_v4  ;;  %v1605_v27 = vsel %vm1568_vm14, %v3690_v2, %v3683_v59  ;;  %v1635_v55 = vsel %vm1572_vm6, %v3670_v36, %v1634_v5 }
 0x141   : > { %v2668_v12 = vrot.slane %v1349_v6, 9  ;;  %v1440_v13 = vadd.f32 %v2666_v7, %v1348_v63  ;;  %v1441_v15 = vadd.f32 %v2667_v8, %v1347_v40  ;;  %v1455_v16 = vmul.f32 0.5, %v1439_v9  ;;  %v3039_v9 = vld [vmem:[%s4122_s2 + $0x58] sm:$0xff]  }
 0x142   : > { %v1350_v17 = vcombine.high %v1294_v10, %v1294_v10  ;;  %v1357_v19 = vrot.slane %v1294_v10, %v3624_v31  ;;  %v1603_v18 = vsel %vm1564_vm13, %v3673_v14, %v1602_v11  ;;  %v1636_v20 = vsel %vm1560_vm9, %v3676_v49, %v1635_v55  ;;  %1974 = vmatpush1.bf16.msra.mxu0 %v3039_v9 }
 0x143   : > { %v1442_v21 = vadd.f32 %v2668_v12, %v1349_v6  ;;  %v1456_v22 = vmul.f32 0.5, %v1440_v13  ;;  %v1457_v23 = vmul.f32 0.5, %v1441_v15  ;;  %v3712_v48 = vrot.slane %v1455_v16, %v3627_v32  ;;  %1975 = vmatprep.subr.bf16.mxu0 %v3129_v26 }
 0x144   : > { %v1364_v28 = vrot.slane %v1350_v17, %v3624_v31  ;;  %v1365_v29 = vcombine.high %v1357_v19, %v1357_v19  ;;  %v2669_v30 = vrot.slane %v1357_v19, 9  ;;  %v1604_v33 = vsel %vm1566_vm1, %v3680_v58, %v1603_v18 }
 0x145   : > { %v1458_v35 = vmul.f32 0.5, %v1442_v21  ;;  %v3720_v37 = vrot.slane %v1456_v22, %v3627_v32  ;;  %v3723_v38 = vrot.slane %v1457_v23, %v3627_v32  ;;  %v1606_v43 = vsel %vm1570_vm10, %v3712_v48, %v1605_v27 }
 0x146   : > { %v1366_v44 = vcombine.high %v1364_v28, %v1364_v28  ;;  %v2670_v50 = vrot.slane %v1365_v29, 9  ;;  %v2671_v47 = vrot.slane %v1364_v28, 9  ;;  %v1443_v56 = vadd.f32 %v2669_v30, %v1357_v19 }
 0x147   : > { %v3729_v57 = vrot.slane %v1458_v35, %v3627_v32  ;;  %v1607_v39 = vsel %vm1572_vm6, %v3720_v37, %v1606_v43  ;;  %v1614_v40 = vsel %vm398_vm0, 0.0, %v1604_v33  ;;  %v1637_v63 = vsel %vm1562_vm12, %v3673_v14, %v1636_v20 }
 0x148   : > { %v2672_v0 = vrot.slane %v1366_v44, 9  ;;  %v1444_v1 = vadd.f32 %v2670_v50, %v1365_v29  ;;  %v1445_v3 = vadd.f32 %v2671_v47, %v1364_v28  ;;  %v1459_v4 = vmul.f32 0.5, %v1443_v56 }
 0x149   : > { %v1608_v5 = vsel %vm1560_vm9, %v3723_v38, %v1607_v39  ;;  %v1619_v6 = vsel %vm1589_vm3, %v1614_v40, 0.0  ;;  %v1638_v7 = vsel %vm1564_vm13, %v3680_v58, %v1637_v63  ;;  %v1640_v8 = vsel %vm1568_vm14, %v3712_v48, %v3690_v2 }
 0x14a   : > { %v1460_v10 = vmul.f32 0.5, %v1444_v1  ;;  %v1461_v11 = vmul.f32 0.5, %v1445_v3  ;;  %v3750_v27 = vrot.slane %v1459_v4, %v3627_v32  ;;  %v1609_v34 = vsel %vm1562_vm12, %v3729_v57, %v1608_v5  ;;  %v3040_v1 = vld [vmem:[%s4122_s2 + $0x60] sm:$0xff]  }
 0x14b   : > { %v1639_v55 = vsel %vm1566_vm1, %v3683_v59, %v1638_v7  ;;  %v1641_v12 = vsel %vm1570_vm10, %v3720_v37, %v1640_v8  ;;  %v1446_v13 = vadd.f32 %v2672_v0, %v1366_v44  ;;  %vm1724_vm0 = vcmp.lt.s32.totalorder %v3644_v52, 8  ;;  %1976 = vmatpush1.bf16.msra.mxu0 %v3040_v1 }
 0x14c   : > { %v1727_v15 = vsel %vm1568_vm14, %v3676_v49, %v3670_v36  ;;  %v3763_v16 = vrot.slane %v1460_v10, %v3627_v32  ;;  %v1610_v17 = vsel %vm1564_vm13, %v3750_v27, %v1609_v34  ;;  %v3768_v19 = vrot.slane %v1461_v11, %v3627_v32  ;;  %1977 = vmatprep.subr.bf16.mxu0 %v3129_v26 }
 0x14d   : > { %v1642_v18 = vsel %vm1572_vm6, %v3723_v38, %v1641_v12  ;;  %v1649_v21 = vsel %vm439_vm5, 0.0, %v1639_v55  ;;  %v1462_v22 = vmul.f32 0.5, %v1446_v13  ;;  %v1728_v23 = vsel %vm1570_vm10, %v3673_v14, %v1727_v15  ;;  %v3041_v55 = vld [vmem:[%s4122_s2 + $0x68] sm:$0xff]  }
 0x14e   : > { %v1643_v20 = vsel %vm1560_vm9, %v3729_v57, %v1642_v18  ;;  %vm1752_vm3 = vcmp.lt.s32.totalorder %v3646_v53, 8  ;;  %v1611_v28 = vsel %vm1566_vm1, %v3763_v16, %v1610_v17  ;;  %v1654_v30 = vsel %vm1623_vm7, %v1649_v21, 0.0 }
 0x14f   : > { %v1644_v29 = vsel %vm1562_vm12, %v3750_v27, %v1643_v20  ;;  %v1729_v33 = vsel %vm1572_vm6, %v3680_v58, %v1728_v23  ;;  %v1620_v35 = vsel %vm1590_vm8, %v1611_v28, 0.0  ;;  %v3793_v44 = vrot.slane %v1462_v22, %v3627_v32  ;;  %1978 = vmatpush1.bf16.msra.mxu0 %v3041_v55 }
 0x150   : > { %v1645_v43 = vsel %vm1564_vm13, %v3763_v16, %v1644_v29  ;;  %v1730_v50 = vsel %vm1560_vm9, %v3683_v59, %v1729_v33  ;;  %v2942_v47 = vpack.i.bf16 %v1620_v35, %v1619_v6  ;;  %v1734_v41 = vsel %vm1568_vm14, %v3729_v57, %v3723_v38 }
 0x151   : > { %v1646_v45 = vsel %vm1566_vm1, %v3768_v19, %v1645_v43  ;;  %v1731_v56 = vsel %vm1562_vm12, %v3690_v2, %v1730_v50  ;;  %v1735_v63 = vsel %vm1570_vm10, %v3750_v27, %v1734_v41  ;;  %v1756_v0 = vsel %vm1568_vm14, %v3673_v14, %v3676_v49 }
 0x152   : > { %v1655_v39 = vsel %vm1624_vm11, %v1646_v45, 0.0  ;;  %v1732_v40 = vsel %vm1564_vm13, %v3712_v48, %v1731_v56  ;;  %2943 = vrot.lane.b32.xlu0 %v2942_v47, %s3131_s22  ;;  %v1736_v4 = vsel %vm1572_vm6, %v3763_v16, %v1735_v63  ;;  %v1757_v5 = vsel %vm1570_vm10, %v3680_v58, %v1756_v0 }
 0x153   : > { %v2947_v3 = vpack.i.bf16 %v1655_v39, %v1654_v30  ;;  %v1733_v51 = vsel %vm1566_vm1, %v3720_v37, %v1732_v40  ;;  %v1737_v6 = vsel %vm1560_vm9, %v3768_v19, %v1736_v4  ;;  %v1758_v8 = vsel %vm1572_vm6, %v3683_v59, %v1757_v5 }
 0x154   : > { %v1746_v7 = vsel %vm1723_vm2, %v1733_v51, 0.0  ;;  %v1763_v9 = vsel %vm1568_vm14, %v3750_v27, %v3729_v57  ;;  %vm1489_vm5 = vcmp.ge.s32.totalorder %v3652_v60, 0  ;;  %v1738_v10 = vsel %vm1562_vm12, %v3793_v44, %v1737_v6 }
 0x155   : > { %2948 = vrot.lane.b32.xlu1 %v2947_v3, %s3132_s29  ;;  %v1759_v46 = vsel %vm1560_vm9, %v3690_v2, %v1758_v8  ;;  %v1764_v11 = vsel %vm1570_vm10, %v3763_v16, %v1763_v9  ;;  %v1671_v34 = vsel %vm1568_vm14, %v3667_v42, %v3664_v24  ;;  %v1741_v12 = vsel %vm545_vm15, %v1738_v10, 0.0 }
 0x156   : > { %v1760_v13 = vsel %vm1562_vm12, %v3712_v48, %v1759_v46  ;;  %v1765_v15 = vsel %vm1572_vm6, %v3768_v19, %v1764_v11  ;;  %v1672_v17 = vsel %vm1570_vm10, %v3670_v36, %v1671_v34  ;;  %v1747_v18 = vsel %vm1724_vm0, %v1741_v12, 0.0 }
 0x157   : > { %v1761_v20 = vsel %vm1564_vm13, %v3720_v37, %v1760_v13  ;;  %v1766_v21 = vsel %vm1560_vm9, %v3793_v44, %v1765_v15  ;;  %v1673_v22 = vsel %vm1572_vm6, %v3676_v49, %v1672_v17  ;;  %vm1490_vm2 = vcmp.ge.s32.totalorder %v3655_v61, 0 }
 0x158   : > { %v2957_v23 = vpack.i.bf16 %v1747_v18, %v1746_v7  ;;  %v1762_v28 = vsel %vm1566_vm1, %v3723_v38, %v1761_v20  ;;  %vm4147_vm15 = vcmask 1044480   ;;  %v1674_v52 = vsel %vm1560_vm9, %v3673_v14, %v1673_v22 }
 0x159   : > { %v1769_v26 = vsel %vm4147_vm15, %v1766_v21, 0.0  ;;  %v1774_v29 = vsel %vm1752_vm3, %v1762_v28, 0.0  ;;  %v1675_v33 = vsel %vm1562_vm12, %v3680_v58, %v1674_v52  ;;  %v1678_v35 = vsel %vm1568_vm14, %v3720_v37, %v3712_v48 }
 0x15a   : > { %v1775_v30 = vsel %vm1753_vm4, %v1769_v26, 0.0  ;;  %2958 = vrot.lane.b32.xlu0 %v2957_v23, %s3131_s22  ;;  %v1676_v50 = vsel %vm1564_vm13, %v3683_v59, %v1675_v33  ;;  %v1679_v53 = vsel %vm1570_vm10, %v3723_v38, %v1678_v35  ;;  %v1561_v54 = vsel %vm1560_vm9, %v3667_v42, %v3664_v24 }
 0x15b   : > { %v2952_v43 = vpack.i.bf16 %v1775_v30, %v1774_v29  ;;  %v1677_v47 = vsel %vm1566_vm1, %v3690_v2, %v1676_v50  ;;  %v1680_v45 = vsel %vm1572_vm6, %v3729_v57, %v1679_v53  ;;  %v1563_v56 = vsel %vm1562_vm12, %v3670_v36, %v1561_v54 }
 0x15c   : > { %v1569_v41 = vsel %vm1568_vm14, %v3683_v59, %v3680_v58  ;;  %v1681_v39 = vsel %vm1560_vm9, %v3750_v27, %v1680_v45  ;;  %v1565_v40 = vsel %vm1564_vm13, %v3676_v49, %v1563_v56  ;;  %v1690_v63 = vadd.s32 1, %v3616_v25  ;;  %v3042_v56 = vld [vmem:[%s4123_s3 + $0x40] sm:$0xff]  }
 0x15d   : > { %2953 = vrot.lane.b32.xlu1 %v2952_v43, %s3132_s29  ;;  %v1571_v24 = vsel %vm1570_vm10, %v3690_v2, %v1569_v41  ;;  %v1682_v0 = vsel %vm1562_vm12, %v3763_v16, %v1681_v39  ;;  %v1567_v3 = vsel %vm1566_vm1, %v3673_v14, %v1565_v40  ;;  %v1697_v51 = vsel %vm1568_vm14, %v3670_v36, %v3667_v42  ;;  %v3043_v41 = vld [vmem:[%s4123_s3] sm:$0xff]   ;;  %v3044_v39 = vld [vmem:[%s4123_s3 + $0x48] sm:$0xff]   ;;  %v3046_v40 = vld [vmem:[%s4123_s3 + $0x50] sm:$0xff]  }
 0x15e   : > { %v1573_v1 = vsel %vm1572_vm6, %v3712_v48, %v1571_v24  ;;  %v1683_v4 = vsel %vm1564_vm13, %v3768_v19, %v1682_v0  ;;  %vm4148_vm4 = vcmask 1042432   ;;  %v1698_v6 = vsel %vm1570_vm10, %v3676_v49, %v1697_v51  ;;  %2825 = vmatprep.subr.bf16.mxu1 %v3042_v56  ;;  %v3045_v24 = vld [vmem:[%s4123_s3 + $0x8] sm:$0xff]   ;;  %v3048_v0 = vld [vmem:[%s4123_s3 + $0x58] sm:$0xff]   ;;  %v3051_v51 = vld [vmem:[%s4123_s3 + $0x20] sm:$0xff]  }
 0x15f   : > { %v1574_v5 = vsel %vm1560_vm9, %v3720_v37, %v1573_v1  ;;  %v1580_v25 = vsel %vm4148_vm4, 0.0, %v1567_v3  ;;  %v1684_v7 = vsel %vm1566_vm1, %v3793_v44, %v1683_v4  ;;  %v1699_v36 = vsel %vm1572_vm6, %v3673_v14, %v1698_v6  ;;  %2826 = vmatpush3.bf16.msra.mxu1 %v3043_v41  ;;  %v3049_v1 = vld [vmem:[%s4123_s3 + $0x18] sm:$0xff]   ;;  %v3050_v3 = vld [vmem:[%s4123_s3 + $0x60] sm:$0xff]   ;;  %v3052_v4 = vld [vmem:[%s4123_s3 + $0x68] sm:$0xff]  }
 0x160   : > { %v1575_v8 = vsel %vm1562_vm12, %v3723_v38, %v1574_v5  ;;  %v1585_v42 = vsel %vm1489_vm5, %v1580_v25, 0.0  ;;  %v2962_v9 = vpack.i.bf16 %v1684_v7, %v1677_v47  ;;  %v1700_v46 = vsel %vm1560_vm9, %v3680_v58, %v1699_v36  ;;  %2827 = vmatprep.subr.bf16.mxu1 %v3044_v39  ;;  %v3053_v5 = vld [vmem:[%s4123_s3 + $0x28] sm:$0xff]   ;;  %v3054_v25 = vld [vmem:[%s4123_s3 + $0x70] sm:$0xff]   ;;  %v2673_v7 = vld [vmem:[%s4126_s6 + $0x1] ss:$0 sm:$0xff] }
 0x161   : > { %v1576_v10 = vsel %vm1564_vm13, %v3729_v57, %v1575_v8  ;;  %v1704_v49 = vsel %vm1568_vm14, %v3723_v38, %v3720_v37  ;;  %vm1693_vm11 = vcmp.lt.s32.totalorder %v3657_v62, 8  ;;  %v1701_v60 = vsel %vm1562_vm12, %v3683_v59, %v1700_v46  ;;  %v3055_v6 = vld [vmem:[%s4123_s3 + $0x30] sm:$0xff]  }
 0x162   : > { %v1577_v11 = vsel %vm1566_vm1, %v3750_v27, %v1576_v10  ;;  %v1705_v14 = vsel %vm1570_vm10, %v3729_v57, %v1704_v49  ;;  %2963 = vrot.lane.b32.xlu0 %v2962_v9, %s3133_s19  ;;  %v1702_v34 = vsel %vm1564_vm13, %v3690_v2, %v1701_v60  ;;  %vm1694_vm7 = vcmp.lt.s32.totalorder %v1690_v63, 8  ;;  %v3047_v63 = vld [vmem:[%s4123_s3 + $0x10] sm:$0xff]   ;;  %v2689_v9 = vld [vmem:[%s4126_s6 + $0x6] ss:$0 sm:$0xff]  ;;  %s2484_s19 = scalar_lea.sflag [#allocation3], %s270_s14 }
 0x163   : > { %v1586_v58 = vsel %vm1490_vm2, %v1577_v11, 0.0  ;;  %v1706_v37 = vsel %vm1572_vm6, %v3750_v27, %v1705_v14  ;;  %v1703_v62 = vsel %vm1566_vm1, %v3712_v48, %v1702_v34  ;;  %vm4149_vm10 = vcmask 1046528   ;;  %2828 = vmatpush3.bf16.msra.mxu1 %v3045_v24 }
 0x164   : > { %v1707_v59 = vsel %vm1560_vm9, %v3763_v16, %v1706_v37  ;;  %v1717_v57 = vsel %vm1693_vm11, %v1703_v62, 0.0  ;;  %vm1816_vm6 = vcmask 261120   ;;  %vm1819_vm9 = vcmask 523264   ;;  %2829 = vmatprep.subr.bf16.mxu1 %v3046_v40 }
 0x165   : > { %v1708_v38 = vsel %vm1562_vm12, %v3768_v19, %v1707_v59  ;;  %vm1822_vm12 = vcmask 785408  }
 0x166   : > { %v1709_v61 = vsel %vm1564_vm13, %v3793_v44, %v1708_v38  ;;  %vm3135_vm13 = vmmov 0  }
 0x167   : > { %v1712_v55 = vsel %vm4149_vm10, %v1709_v61, 0.0  ;;  %2830 = vmatpush3.bf16.msra.mxu1 %v3047_v63 }
 0x168   : > { %v1718_v2 = vsel %vm1694_vm7, %v1712_v55, 0.0  ;;  %2831 = vmatprep.subr.bf16.mxu1 %v3048_v0 }
 0x16b   : > { %2832 = vmatpush3.bf16.msra.mxu1 %v3049_v1 }
 0x16c   : > { %2833 = vmatprep.subr.bf16.mxu1 %v3050_v3 }
 0x16f   : > { %2834 = vmatpush3.bf16.msra.mxu1 %v3051_v51 }
 0x170   : > { %2835 = vmatprep.subr.bf16.mxu1 %v3052_v4 }
 0x173   : > { %2836 = vmatpush3.bf16.msra.mxu1 %v3053_v5 }
 0x174   : > { %2837 = vmatprep.subr.bf16.mxu1 %v3054_v25 }
 0x177   : > { %2838 = vmatpush3.bf16.msra.mxu1 %v3055_v6 }
 0x1c4   : > { %v2944_v12 = vpop.permute.xlu0 %2943 }
 0x1c5   : > { %v2946_v48 = vunpack.i.h.bf16 %v2944_v12  ;;  %v2945_v18 = vunpack.i.l.bf16 %v2944_v12 }
 0x1c7   : > { %v2949_v13 = vpop.permute.xlu1 %2948  ;;  %v1818_v29 = vsel %vm1816_vm6, %v1586_v58, %v2946_v48  ;;  %v1817_v30 = vsel %vm1816_vm6, %v1585_v42, %v2945_v18 }
 0x1c8   : > { %v2951_v28 = vunpack.i.h.bf16 %v2949_v13  ;;  %v2950_v26 = vunpack.i.l.bf16 %v2949_v13 }
 0x1ca   : > { %v1820_v50 = vsel %vm1819_vm9, %v1817_v30, %v2950_v26  ;;  %v1821_v53 = vsel %vm1819_vm9, %v1818_v29, %v2951_v28 }
 0x1cc   : > { %v2959_v27 = vpop.permute.xlu0 %2958 }
 0x1cd   : > { %v2961_v15 = vunpack.i.h.bf16 %v2959_v27  ;;  %v2960_v17 = vunpack.i.l.bf16 %v2959_v27 }
 0x1cf   : > { %v2954_v16 = vpop.permute.xlu1 %2953  ;;  %v1826_v20 = vsel %vm1816_vm6, %v1718_v2, %v2961_v15  ;;  %v1825_v19 = vsel %vm1816_vm6, %v1717_v57, %v2960_v17 }
 0x1d0   : > { %v2956_v21 = vunpack.i.h.bf16 %v2954_v16  ;;  %v2955_v22 = vunpack.i.l.bf16 %v2954_v16 }
 0x1d2   : > { %v1827_v44 = vsel %vm1819_vm9, %v1825_v19, %v2955_v22  ;;  %v1828_v23 = vsel %vm1819_vm9, %v1826_v20, %v2956_v21 }
 0x1d3   : > { %v1858_v52 = vpack.c.bf16 %v1828_v23, %v1827_v44 }
 0x1d4   : > { %v2964_v33 = vpop.permute.xlu0 %2963 }
 0x1d5   : > { %2688 = vmatprep.mubr.msk.bf16.mxu0 %vm1822_vm12, %v1858_v52  ;;  %v2966_v35 = vunpack.i.h.bf16 %v2964_v33  ;;  %v2965_v43 = vunpack.i.l.bf16 %v2964_v33 }
 0x1d7   : > { %v1823_v54 = vsel %vm1822_vm12, %v1820_v50, %v2965_v43  ;;  %v1824_v47 = vsel %vm1822_vm12, %v1821_v53, %v2966_v35 }
 0x1d8   : > { %v1857_v45 = vpack.c.bf16 %v1824_v47, %v1823_v54  ;;  %v3056_v47 = vld [vmem:[%s4123_s3 + $0x78] sm:$0xff]  }
 0x1d9   : > { %2839 = vmatprep.subr.bf16.mxu1 %v3056_v47 }
 0x1da   : > { %1984 = vmatmul.mubr.bf16.vlgmr.msra.gmra.mrb[16].mxu0 %v1857_v45  ;;  %v3057_v45 = vld [vmem:[%s4123_s3 + $0x38] sm:$0xff]  }
 0x1db   : > { %2840 = vmatpush3.bf16.msra.mxu1 %v3057_v45 }
 0x2ad   : > { %v1985_v8 = vpop.f32.mrb[16].mxu0 }
 0x2ae   : > { %v1986_v42 = vadd.f32 %v2673_v7, %v1985_v8  ;;  %v1987_v36 = vpop.f32.mrb[17].mxu0 }
 0x2af   : > { %v1988_v10 = vpop.f32.mrb[18].mxu0 }
 0x2b0   : > { %v1995_v46 = vmin.f32 %v1986_v42, 0.0  ;;  %v1989_v49 = vadd.f32 %v2673_v7, %v1988_v10  ;;  %v1990_v11 = vpop.f32.mrb[19].mxu0  ;;  %v1993_v60 = vmax.f32 %v1986_v42, 0.0  ;;  %v3134_v7 = vmov 0.0  }
 0x2b1   : > { %2875 = vmatprep.subr.bf16.mxu1 %v3134_v7 }
 0x2b2   : > { %v2001_v14 = vmul.f32 %v2689_v9, %v1995_v46  ;;  %v1996_v58 = vmin.f32 %v1989_v49, 0.0  ;;  %v1994_v37 = vmax.f32 %v1989_v49, 0.0 }
 0x2b4   : > { %v2003_v34 = vadd.f32 %v2001_v14, %v1993_v60  ;;  %v2002_v62 = vmul.f32 %v2689_v9, %v1996_v58  ;;  %v3059_v14 = vld [vmem:[%s4124_s4 + $0x8] sm:$0xff]   ;;  %v3060_v58 = vld [vmem:[%s4124_s4 + $0x10] sm:$0xff]  }
 0x2b6   : > { %v2007_v59 = vcombine.high %v2003_v34, %v2003_v34  ;;  %v2014_v38 = vrot.slane %v2003_v34, %v3624_v31  ;;  %v2004_v57 = vadd.f32 %v2002_v62, %v1994_v37  ;;  %v3061_v34 = vld [vmem:[%s4124_s4 + $0x18] sm:$0xff]   ;;  %v2698_v62 = vld [vmem:[%s4126_s6 + $0x2] ss:$0 sm:$0xff] }
 0x2b8   : > { %v2021_v61 = vrot.slane %v2007_v59, %v3624_v31  ;;  %v2022_v55 = vcombine.high %v2014_v38, %v2014_v38  ;;  %v2690_v2 = vrot.slane %v2014_v38, 9  ;;  %v2024_v12 = vcombine.high %v2004_v57, %v2004_v57 }
 0x2b9   : > { %v2031_v13 = vrot.slane %v2004_v57, %v3624_v31 }
 0x2ba   : > { %v2023_v27 = vcombine.high %v2021_v61, %v2021_v61  ;;  %v2691_v15 = vrot.slane %v2022_v55, 9  ;;  %v2692_v17 = vrot.slane %v2021_v61, 9  ;;  %v2073_v48 = vadd.f32 %v2690_v2, %v2014_v38  ;;  %v2715_v2 = vld [vmem:[%s4126_s6 + $0x7] ss:$0 sm:$0xff] }
 0x2bb   : > { %v2038_v18 = vrot.slane %v2024_v12, %v3624_v31  ;;  %v2039_v16 = vcombine.high %v2031_v13, %v2031_v13  ;;  %v2694_v20 = vrot.slane %v2031_v13, 9 }
 0x2bc   : > { %v2075_v19 = vadd.f32 %v2692_v17, %v2021_v61  ;;  %v2081_v21 = vmul.f32 0.5, %v2073_v48  ;;  %v2693_v22 = vrot.slane %v2023_v27, 9  ;;  %v2074_v44 = vadd.f32 %v2691_v15, %v2022_v55  ;;  %v3062_v48 = vld [vmem:[%s4125_s5] sm:$0xff]  }
 0x2bd   : > { %v2040_v23 = vcombine.high %v2038_v18, %v2038_v18  ;;  %v2695_v28 = vrot.slane %v2039_v16, 9  ;;  %v2696_v26 = vrot.slane %v2038_v18, 9  ;;  %v2077_v52 = vadd.f32 %v2694_v20, %v2031_v13 }
 0x2be   : > { %v2076_v29 = vadd.f32 %v2693_v22, %v2023_v27  ;;  %v2082_v30 = vmul.f32 0.5, %v2074_v44  ;;  %v2083_v33 = vmul.f32 0.5, %v2075_v19  ;;  %v2094_v31 = vrot.slane %v2081_v21, %v3627_v32  ;;  %v2722_v22 = vld [vmem:[%s4126_s6 + $0x8] ss:$0 sm:$0xff] }
 0x2bf   : > { %v2079_v35 = vadd.f32 %v2696_v26, %v2038_v18  ;;  %v2085_v43 = vmul.f32 0.5, %v2077_v52  ;;  %v2697_v50 = vrot.slane %v2040_v23, 9  ;;  %v2078_v53 = vadd.f32 %v2695_v28, %v2039_v16  ;;  %v3063_v18 = vld [vmem:[%s4125_s5 + $0x8] sm:$0xff]   ;;  %v2716_v16 = vld [vmem:[%s4126_s6 + $0x3] ss:$0 sm:$0xff] }
 0x2c0   : > { %v2084_v54 = vmul.f32 0.5, %v2076_v29  ;;  %v2106_v40 = vrot.slane %v2082_v30, %v3627_v32  ;;  %v2120_v63 = vrot.slane %v2083_v33, %v3627_v32  ;;  %v2723_v33 = vld [vmem:[%s4126_s6 + $0x4] ss:$0 sm:$0xff] }
 0x2c1   : > { %v2080_v56 = vadd.f32 %v2697_v50, %v2040_v23  ;;  %v2086_v41 = vmul.f32 0.5, %v2078_v53  ;;  %v2098_v39 = vrot.slane %v2085_v43, %v3627_v32  ;;  %v2087_v24 = vmul.f32 0.5, %v2079_v35 }
 0x2c2   : > { %v2132_v5 = vrot.slane %v2084_v54, %v3627_v32 }
 0x2c3   : > { %v2088_v0 = vmul.f32 0.5, %v2080_v56  ;;  %v2110_v1 = vrot.slane %v2086_v41, %v3627_v32  ;;  %v2099_v3 = vsel %vm1568_vm14, %v2098_v39, %v2094_v31  ;;  %v2124_v51 = vrot.slane %v2087_v24, %v3627_v32 }
 0x2c5   : > { %v2111_v4 = vsel %vm1568_vm14, %v2110_v1, %v2106_v40  ;;  %v2136_v25 = vrot.slane %v2088_v0, %v3627_v32  ;;  %v2125_v6 = vsel %vm1568_vm14, %v2124_v51, %v2120_v63  ;;  %v3058_v32 = vld [vmem:[%s4124_s4] sm:$0xff]  }
 0x2c7   : > { %v2137_v8 = vsel %vm1568_vm14, %v2136_v25, %v2132_v5 }
 0x2c8   : > { %v2967_v42 = vpack.i.bf16 %v2111_v4, %v2137_v8 }
 0x2ca   : > { %2968 = vrot.lane.b32.xlu1 %v2967_v42, %s3132_s29  ;;  %s3068_s29 = sshll.u32 %s3136_s23, 4  ;;  %s3069_s29 = int_to_ptr.vmem [resolvable:$false] %s3068_s29 }
 0x2cb   : > { %s3070_s13 = scalar_lea.vmem %s3069_s29, 64  ;;  %p3071_p0 = scmp.lt.s32.totalorder %s4080_s21, %s3069_s29 }
 0x2cc   : > { %p3072_p1 = scmp.lt.s32.totalorder %s3070_s13, %s3064_s28 }
 0x2ce   : > { %p3073_p2 = por %p3072_p1, %p3071_p0 }
 0x2d0   : > { %p3074_p3 = pnand %p3073_p2, %p3067_p13 }
 0x33c   : > { %v2969_v36 = vpop.permute.xlu1 %2968 }
 0x33d   : > { %v2971_v9 = vunpack.i.h.bf16 %v2969_v36  ;;  %v2970_v10 = vunpack.i.l.bf16 %v2969_v36 }
 0x33f   : > { %v2141_v46 = vsel %vm1819_vm9, %v2099_v3, %v2971_v9  ;;  %v2142_v49 = vsel %vm1819_vm9, %v2125_v6, %v2970_v10 }
 0x340   : > { %v2175_v11 = vpack.c.bf16 %v2141_v46, %v2141_v46  ;;  %v2176_v60 = vpack.c.bf16 %v2142_v49, %v2142_v49 }
 0x342   : > { %2310 = vmatprep.mubr.bf16.mxu1 %v2176_v60 }
 0x343   : > { %2311 = vmatmul.mubr.bf16.vlgmr.msra.gmra.mrb[12].mxu1 %v2175_v11 }
 0x344   : > { %2876 = vmatpush3.bf16.msra.mxu1 %v3058_v32  ;;  %2883 = vmatprep.mubr.msk.bf16.mxu1 %vm3135_vm13, %v3134_v7 }
 0x345   : > { %2877 = vmatprep.subr.bf16.mxu1 %v3134_v7 }
 0x348   : > { %2878 = vmatpush3.bf16.msra.mxu1 %v3059_v14 }
 0x349   : > { %2879 = vmatprep.subr.bf16.mxu1 %v3134_v7 }
 0x34c   : > { %2880 = vmatpush3.bf16.msra.mxu1 %v3060_v58 }
 0x34d   : > { %2881 = vmatprep.subr.bf16.mxu1 %v3134_v7 }
 0x350   : > { %2882 = vmatpush3.bf16.msra.mxu1 %v3061_v34 }
 0x351   : > { %2887 = vmatprep.subr.bf16.mxu1 %v3134_v7 }
 0x416   : > { %v2841_v37 = vpop.f32.mrb[12].mxu1 }
 0x417   : > { %v2842_v59 = vpop.f32.mrb[13].mxu1 }
 0x418   : > { %v2843_v38 = vadd.f32 %v2842_v59, %v2841_v37  ;;  %v2844_v57 = vpop.f32.mrb[14].mxu1 }
 0x419   : > { %v2845_v61 = vpop.f32.mrb[15].mxu1 }
 0x41a   : > { %v2313_v55 = vadd.f32 %v2843_v38, %v2698_v62 }
 0x41c   : > { %v2320_v12 = vmin.f32 %v2313_v55, 0.0  ;;  %v2319_v13 = vmax.f32 %v2313_v55, 0.0 }
 0x41e   : > { %v2325_v27 = vmul.f32 %v2715_v2, %v2320_v12 }
 0x420   : > { %v2326_v15 = vadd.f32 %v2325_v27, %v2319_v13 }
 0x422   : > { %v2335_v17 = vpack.c.bf16 %v2326_v15, %v2326_v15 }
 0x424   : > { %2884 = vmatmul.mubr.msk.bf16.vlgmr.msra.gmra.mrb[16].mxu1 %vm1819_vm9, %v2335_v17 }
 0x425   : > { %2891 = vmatprep.mubr.msk.bf16.mxu1 %vm3135_vm13, %v3134_v7  ;;  %2888 = vmatpush3.bf16.msra.mxu1 %v3062_v48 }
 0x426   : > { %2889 = vmatprep.subr.bf16.mxu1 %v3134_v7 }
 0x429   : > { %2890 = vmatpush3.bf16.msra.mxu1 %v3063_v18 }
 0x4f7   : > { %v2402_v20 = vpop.f32.mrb[16].mxu1 }
 0x4f8   : > { %v2403_v19 = vadd.f32 %v2716_v16, %v2402_v20  ;;  %v2885_v21 = vpop.f32.mrb[17].mxu1 }
 0x4f9   : > { %v2405_v44 = vpop.f32.mrb[18].mxu1 }
 0x4fa   : > { %v2410_v23 = vmin.f32 %v2403_v19, 0.0  ;;  %v2886_v28 = vpop.f32.mrb[19].mxu1  ;;  %v2409_v26 = vmax.f32 %v2403_v19, 0.0 }
 0x4fc   : > { %v2415_v52 = vmul.f32 %v2722_v22, %v2410_v23 }
 0x4fe   : > { %v2416_v29 = vadd.f32 %v2415_v52, %v2409_v26 }
 0x500   : > { %v2421_v30 = vpack.c.bf16 %v2416_v29, %v2416_v29 }
 0x502   : > { %2892 = vmatmul.mubr.msk.bf16.vlgmr.msra.gmra.mrb[20].mxu1 %vm1816_vm6, %v2421_v30 }
 0x5d5   : > { %v2476_v35 = vpop.f32.mrb[20].mxu1 }
 0x5d6   : > { %v2477_v43 = vadd.f32 %v2723_v33, %v2476_v35  ;;  %v2893_v50 = vpop.f32.mrb[21].mxu1 }
 0x5d7   : > { %v2479_v53 = vpop.f32.mrb[22].mxu1 }
 0x5d8   : > { %2482 = vst [vmem:[%s272_s20] sm:$0x3] %v2477_v43  ;;  %v2894_v54 = vpop.f32.mrb[23].mxu1 }
 0x5d9   : > { %3077 = shalt.err (!%p3074_p3)
}
 0x5da   : > { %s3078_s14 = scalar_lea.hbm %s4078_s9, 32  ;;  %s3082_s17 = scalar_lea.hbm %s4127_s7, 64 }
 0x5db   : > { %p3079_p4 = scmp.ne.s32.totalorder %s4078_s9, %s3078_s14  ;;  %p3083_p9 = scmp.lt.u32.totalorder %s4078_s9, %s4127_s7 }
 0x5dc   : > { %p3084_p10 = scmp.lt.u32.totalorder %s3082_s17, %s3078_s14  ;;  %p3086_p12 = scmp.lt.u32.totalorder %s3078_s14, %s4078_s9 }
 0x5dd   : > { %p3080_p7 = pnand %p3079_p4, %p3215_p5 }
 0x5de   : > { %p3085_p11 = por %p3084_p10, %p3083_p9 }
 0x5df   : > { %p3081_p8 = pneg %p3080_p7 }
 0x5e0   : > { %p3087_p13 = por %p3086_p12, %p3085_p11 }
 0x5e2   : > { %p3088_p0 = pnand %p3087_p13, %p3081_p8 }
 0x5e4   : > { %3091 = shalt.err (!%p3088_p0)
}
 0x5e5   : > { %2895 = dma.vmem_to_hbm [thread:$0]  (%p3215_p5), %s4080_s21, 32, %s4078_s9, %s2484_s19  }
 0x5e6 PF: > { %p2901_p1 = scmp.ge.s32.totalorder %s3126_s27, 2  ;;  %s2509_s22 = sand.u32 1, %s3114_s24  }
 0x5e7   : > { %s2510_s8 = scalar_lea.sflag [#allocation3], %s2509_s22 }
 0x5e8   : > { %p2898_p2 = pnand %p2901_p1, %p3219_p6 }
 0x5ea   : > { %3109 = dma.done.wait (!%p2898_p2), %s2510_s8, 32  }
 0x5eb   : > { %3111 = vsyncadd (!%p2898_p2), %s2510_s8, 4294967264  ;;  %p17_p3 = scmp.ge.s32.totalorder %s3202_s30, 4   ;;  %s4150_s24 = smov %s3118_s25 }
 0x5ec   : > { %s4151_s25 = smov %s3122_s26  ;;  %s4152_s26 = smov %s3213_s10 }
 0x5ed   : > { %s4153_s27 = smov %s3202_s30  ;;  %19 = sbr.rel (!%p17_p3) target bundleno = 3 (0x3), region = 83 }
 0x5f4   :  { %2515 = vsyncpa [#allocation3], 1 }
 0x5f5   :  { %2517 = vsyncpa [#allocation3 + $0x1], 1 }

</bundles_post_ra>
